<compile_context>
chip_gen: v5e
topology: v5e:2x2
jax: 0.10.0
libtpu: 0.0.40
codegen_flags: <defaults>
</compile_context>

<pallas_src>
import jax
import jax.numpy as jnp
from jax.experimental import pallas as pl
from jax.experimental.pallas import tpu as pltpu


def lstm_fc_kernel(x_ref, wih_ref, whh_ref, b_ref, wfc_ref, bfc_ref, out_ref):
    """One grid step = the full sequence for one batch tile.

    x_ref   : (TB, T, Din)  inputs for this batch tile (matmul dtype)
    wih_ref : (Din, 4H)     input-to-hidden weights, transposed (gate order i,f,g,o)
    whh_ref : (H, 4H)       hidden-to-hidden weights, transposed
    b_ref   : (1, 4H)       combined bias (b_ih + b_hh), float32
    wfc_ref : (H, O)        fc weights, transposed
    bfc_ref : (1, O)        fc bias, float32
    out_ref : (TB, T, O)    outputs for this batch tile
    """
    TB, T, Din = x_ref.shape
    H, fourH = whh_ref.shape
    O = wfc_ref.shape[1]
    cdtype = whh_ref.dtype  # MXU operand dtype (f32 or bf16)

    # ---- Hoisted input projection: one big MXU matmul for all timesteps. ----
    x_all = x_ref[...].reshape(TB * T, Din)
    xw = jnp.dot(x_all, wih_ref[...], preferred_element_type=jnp.float32)
    xw = xw.reshape(TB, T, fourH) + b_ref[...]          # f32, bias broadcast

    whh = whh_ref[...]

    # ---- Sequential recurrence (only h @ W_hh stays inside the loop). ----
    h = jnp.zeros((TB, H), jnp.float32)
    c = jnp.zeros((TB, H), jnp.float32)
    hs = []
    for t in range(T):  # static T -> fully unrolled, static slicing only
        gates = xw[:, t, :] + jnp.dot(h.astype(cdtype), whh,
                                      preferred_element_type=jnp.float32)
        i_g = jax.nn.sigmoid(gates[:, 0 * H:1 * H])
        f_g = jax.nn.sigmoid(gates[:, 1 * H:2 * H])
        g_g = jnp.tanh(gates[:, 2 * H:3 * H])
        o_g = jax.nn.sigmoid(gates[:, 3 * H:4 * H])
        c = f_g * c + i_g * g_g
        h = o_g * jnp.tanh(c)
        hs.append(h)

    # ---- Deferred fc: one big matmul + one contiguous output store. ----
    h_all = jnp.stack(hs, axis=1)                        # (TB, T, H) f32
    y = jnp.dot(h_all.reshape(TB * T, H).astype(cdtype), wfc_ref[...],
                preferred_element_type=jnp.float32) + bfc_ref[...]
    out_ref[...] = y.reshape(TB, T, O).astype(out_ref.dtype)


def lstm_model_forward(x, params, *, batch_block=None,
                       matmul_dtype=jnp.float32):
    """x: (B, T, Din) float32 -> (B, T, O) float32.

    batch_block : batch tile size (grid axis, marked "parallel" for megacore).
    matmul_dtype: dtype of MXU operands (weights/x/h); carries, biases and
                  elementwise math stay in float32 regardless.
    """
    w_ih, w_hh, b_ih, b_hh, w_fc, b_fc = (
        params["w_ih"], params["w_hh"], params["b_ih"], params["b_hh"],
        params["w_fc"], params["b_fc"])

    B, T, Din = x.shape
    fourH = w_ih.shape[0]
    H = fourH // 4
    O = w_fc.shape[0]

    if batch_block is None or B % batch_block != 0:
        batch_block = B
    nb = B // batch_block

    # Pre-transpose weights once so the kernel does plain (M,K)@(K,N) matmuls.
    wih_t = jnp.transpose(w_ih).astype(matmul_dtype)     # (Din, 4H)
    whh_t = jnp.transpose(w_hh).astype(matmul_dtype)     # (H, 4H)
    bias = (b_ih + b_hh).reshape(1, fourH).astype(jnp.float32)
    wfc_t = jnp.transpose(w_fc).astype(matmul_dtype)     # (H, O)
    bfc = b_fc.reshape(1, O).astype(jnp.float32)
    x_in = x.astype(matmul_dtype)                        # (B, T, Din), no transpose

    return pl.pallas_call(
        lstm_fc_kernel,
        out_shape=jax.ShapeDtypeStruct((B, T, O), jnp.float32),
        grid=(nb,),
        in_specs=[
            pl.BlockSpec((batch_block, T, Din), lambda b: (b, 0, 0)),
            pl.BlockSpec((Din, fourH), lambda b: (0, 0)),
            pl.BlockSpec((H, fourH), lambda b: (0, 0)),
            pl.BlockSpec((1, fourH), lambda b: (0, 0)),
            pl.BlockSpec((H, O), lambda b: (0, 0)),
            pl.BlockSpec((1, O), lambda b: (0, 0)),
        ],
        out_specs=pl.BlockSpec((batch_block, T, O), lambda b: (b, 0, 0)),
        compiler_params=pltpu.CompilerParams(
            dimension_semantics=("parallel",),   # batch tiles are independent
        ),
    )(x_in, wih_t, whh_t, bias, wfc_t, bfc)


def init_params(key, input_dim, hidden_dim, output_dim):
    """Deterministic init mirroring PyTorch's uniform(-1/sqrt(H), 1/sqrt(H))."""
    ks = jax.random.split(key, 6)
    k_lstm = 1.0 / jnp.sqrt(hidden_dim)
    k_fc = 1.0 / jnp.sqrt(hidden_dim)
    u = lambda k, shape, lim: jax.random.uniform(k, shape, jnp.float32, -lim, lim)
    return {
        "w_ih": u(ks[0], (4 * hidden_dim, input_dim), k_lstm),
        "w_hh": u(ks[1], (4 * hidden_dim, hidden_dim), k_lstm),
        "b_ih": u(ks[2], (4 * hidden_dim,), k_lstm),
        "b_hh": u(ks[3], (4 * hidden_dim,), k_lstm),
        "w_fc": u(ks[4], (output_dim, hidden_dim), k_fc),
        "b_fc": u(ks[5], (output_dim,), k_fc),
    }


def _reference_forward(x, params):
    """Pure-JAX reference of the same LSTM+fc forward (sanity check)."""
    w_ih, w_hh = params["w_ih"], params["w_hh"]
    b = params["b_ih"] + params["b_hh"]
    w_fc, b_fc = params["w_fc"], params["b_fc"]
    B, T, Din = x.shape
    H = w_hh.shape[1]

    def step(carry, x_t):
        h, c = carry
        gates = x_t @ w_ih.T + h @ w_hh.T + b
        i = jax.nn.sigmoid(gates[:, 0 * H:1 * H])
        f = jax.nn.sigmoid(gates[:, 1 * H:2 * H])
        g = jnp.tanh(gates[:, 2 * H:3 * H])
        o = jax.nn.sigmoid(gates[:, 3 * H:4 * H])
        c = f * c + i * g
        h = o * jnp.tanh(c)
        return (h, c), h

    h0 = jnp.zeros((B, H), jnp.float32)
    c0 = jnp.zeros((B, H), jnp.float32)
    _, hs = jax.lax.scan(step, (h0, c0), jnp.transpose(x, (1, 0, 2)))
    hs = jnp.transpose(hs, (1, 0, 2))                 # (B, T, H)
    return hs @ w_fc.T + b_fc


if __name__ == "__main__":
    INPUT_DIM, HIDDEN_DIM, OUTPUT_DIM = 16, 32, 8   # 4H = 128 -> lane-aligned gates
    B, T = 8, 8

    key = jax.random.PRNGKey(0)
    k_x, k_p = jax.random.split(key, 2)
    params = init_params(k_p, INPUT_DIM, HIDDEN_DIM, OUTPUT_DIM)
    x = jax.random.normal(k_x, (B, T, INPUT_DIM), jnp.float32)

    # Batch-tiled grid (grid=(2,), "parallel"), exact f32 matmuls.
    out = jax.block_until_ready(lstm_model_forward(x, params, batch_block=4))
    ref = jax.block_until_ready(_reference_forward(x, params))
    assert out.shape == (B, T, OUTPUT_DIM), out.shape
    max_err = float(jnp.max(jnp.abs(out - ref)))
    assert jnp.allclose(out, ref, atol=1e-4, rtol=1e-4), max_err

    print("KERNEL_OK")
</pallas_src>

<mosaic_0001>
module attributes {stable_mosaic.version = 11 : i64} {
  func.func @lstm_fc_kernel(%arg0: i32, %arg1: memref<4x8x16xf32, #tpu.memory_space<vmem>>, %arg2: memref<16x128xf32, #tpu.memory_space<vmem>>, %arg3: memref<32x128xf32, #tpu.memory_space<vmem>>, %arg4: memref<1x128xf32, #tpu.memory_space<vmem>>, %arg5: memref<32x8xf32, #tpu.memory_space<vmem>>, %arg6: memref<1x8xf32, #tpu.memory_space<vmem>>, %arg7: memref<4x8x8xf32, #tpu.memory_space<vmem>>) attributes {dimension_semantics = [#tpu.dimension_semantics<parallel>], iteration_bounds = array<i64: 2>, scalar_prefetch = 0 : i64, scratch_operands = 0 : i64, tpu.core_type = #tpu.core_type<tc>, window_params = [{transform_indices = @transform_0, window_bounds = array<i64: 4, 8, 16>}, {pipeline_mode = #tpu.pipeline_mode<synchronous>, transform_indices = @transform_1, window_bounds = array<i64: 16, 128>}, {pipeline_mode = #tpu.pipeline_mode<synchronous>, transform_indices = @transform_2, window_bounds = array<i64: 32, 128>}, {pipeline_mode = #tpu.pipeline_mode<synchronous>, transform_indices = @transform_3, window_bounds = array<i64: 1, 128>}, {pipeline_mode = #tpu.pipeline_mode<synchronous>, transform_indices = @transform_4, window_bounds = array<i64: 32, 8>}, {pipeline_mode = #tpu.pipeline_mode<synchronous>, transform_indices = @transform_5, window_bounds = array<i64: 1, 8>}, {transform_indices = @transform_6, window_bounds = array<i64: 4, 8, 8>}]} {
    %c0 = arith.constant 0 : index
    %c0_0 = arith.constant 0 : index
    %c0_1 = arith.constant 0 : index
    %0 = vector.load %arg1[%c0, %c0_0, %c0_1] : memref<4x8x16xf32, #tpu.memory_space<vmem>>, vector<4x8x16xf32>
    %1 = vector.shape_cast %0 : vector<4x8x16xf32> to vector<32x16xf32>
    %c0_2 = arith.constant 0 : index
    %c0_3 = arith.constant 0 : index
    %2 = vector.load %arg2[%c0_2, %c0_3] : memref<16x128xf32, #tpu.memory_space<vmem>>, vector<16x128xf32>
    %cst = arith.constant dense<0.000000e+00> : vector<32x128xf32>
    %3 = tpu.matmul %1, %2, %cst {dimension_numbers = #tpu.dot_dimension_numbers<[1], [0], [0], [1], [0, 0, 1, 1], [], []>} : vector<32x16xf32>, vector<16x128xf32>, vector<32x128xf32> -> vector<32x128xf32>
    %4 = vector.shape_cast %3 : vector<32x128xf32> to vector<4x8x128xf32>
    %c0_4 = arith.constant 0 : index
    %c0_5 = arith.constant 0 : index
    %5 = vector.load %arg4[%c0_4, %c0_5] : memref<1x128xf32, #tpu.memory_space<vmem>>, vector<1x128xf32>
    %6 = vector.shape_cast %5 : vector<1x128xf32> to vector<1x1x128xf32>
    %7 = vector.broadcast %6 : vector<1x1x128xf32> to vector<4x8x128xf32>
    %8 = arith.addf %4, %7 : vector<4x8x128xf32>
    %c0_6 = arith.constant 0 : index
    %c0_7 = arith.constant 0 : index
    %9 = vector.load %arg3[%c0_6, %c0_7] : memref<32x128xf32, #tpu.memory_space<vmem>>, vector<32x128xf32>
    %cst_8 = arith.constant 0.000000e+00 : f32
    %10 = vector.broadcast %cst_8 : f32 to vector<4x32xf32>
    %cst_9 = arith.constant 0.000000e+00 : f32
    %11 = vector.broadcast %cst_9 : f32 to vector<4x32xf32>
    %12 = vector.extract_strided_slice %8 {offsets = [0, 0, 0], sizes = [4, 1, 128], strides = [1, 1, 1]} : vector<4x8x128xf32> to vector<4x1x128xf32>
    %13 = vector.shape_cast %12 : vector<4x1x128xf32> to vector<4x128xf32>
    %cst_10 = arith.constant dense<0.000000e+00> : vector<4x128xf32>
    %14 = tpu.matmul %10, %9, %cst_10 {dimension_numbers = #tpu.dot_dimension_numbers<[1], [0], [0], [1], [0, 0, 1, 1], [], []>} : vector<4x32xf32>, vector<32x128xf32>, vector<4x128xf32> -> vector<4x128xf32>
    %15 = arith.addf %13, %14 : vector<4x128xf32>
    %16 = vector.extract_strided_slice %15 {offsets = [0, 0], sizes = [4, 32], strides = [1, 1]} : vector<4x128xf32> to vector<4x32xf32>
    %17 = arith.negf %16 : vector<4x32xf32>
    %18 = math.exp %17 : vector<4x32xf32>
    %cst_11 = arith.constant 1.000000e+00 : f32
    %19 = vector.broadcast %cst_11 : f32 to vector<4x32xf32>
    %20 = arith.addf %19, %18 : vector<4x32xf32>
    %21 = arith.divf %19, %20 : vector<4x32xf32>
    %22 = vector.extract_strided_slice %15 {offsets = [0, 32], sizes = [4, 32], strides = [1, 1]} : vector<4x128xf32> to vector<4x32xf32>
    %23 = arith.negf %22 : vector<4x32xf32>
    %24 = math.exp %23 : vector<4x32xf32>
    %cst_12 = arith.constant 1.000000e+00 : f32
    %25 = vector.broadcast %cst_12 : f32 to vector<4x32xf32>
    %26 = arith.addf %25, %24 : vector<4x32xf32>
    %27 = arith.divf %25, %26 : vector<4x32xf32>
    %28 = vector.extract_strided_slice %15 {offsets = [0, 64], sizes = [4, 32], strides = [1, 1]} : vector<4x128xf32> to vector<4x32xf32>
    %29 = math.tanh %28 : vector<4x32xf32>
    %30 = vector.extract_strided_slice %15 {offsets = [0, 96], sizes = [4, 32], strides = [1, 1]} : vector<4x128xf32> to vector<4x32xf32>
    %31 = arith.negf %30 : vector<4x32xf32>
    %32 = math.exp %31 : vector<4x32xf32>
    %cst_13 = arith.constant 1.000000e+00 : f32
    %33 = vector.broadcast %cst_13 : f32 to vector<4x32xf32>
    %34 = arith.addf %33, %32 : vector<4x32xf32>
    %35 = arith.divf %33, %34 : vector<4x32xf32>
    %36 = arith.mulf %27, %11 : vector<4x32xf32>
    %37 = arith.mulf %21, %29 : vector<4x32xf32>
    %38 = arith.addf %36, %37 : vector<4x32xf32>
    %39 = math.tanh %38 : vector<4x32xf32>
    %40 = arith.mulf %35, %39 : vector<4x32xf32>
    %41 = vector.extract_strided_slice %8 {offsets = [0, 1, 0], sizes = [4, 1, 128], strides = [1, 1, 1]} : vector<4x8x128xf32> to vector<4x1x128xf32>
    %42 = vector.shape_cast %41 : vector<4x1x128xf32> to vector<4x128xf32>
    %cst_14 = arith.constant dense<0.000000e+00> : vector<4x128xf32>
    %43 = tpu.matmul %40, %9, %cst_14 {dimension_numbers = #tpu.dot_dimension_numbers<[1], [0], [0], [1], [0, 0, 1, 1], [], []>} : vector<4x32xf32>, vector<32x128xf32>, vector<4x128xf32> -> vector<4x128xf32>
    %44 = arith.addf %42, %43 : vector<4x128xf32>
    %45 = vector.extract_strided_slice %44 {offsets = [0, 0], sizes = [4, 32], strides = [1, 1]} : vector<4x128xf32> to vector<4x32xf32>
    %46 = arith.negf %45 : vector<4x32xf32>
    %47 = math.exp %46 : vector<4x32xf32>
    %cst_15 = arith.constant 1.000000e+00 : f32
    %48 = vector.broadcast %cst_15 : f32 to vector<4x32xf32>
    %49 = arith.addf %48, %47 : vector<4x32xf32>
    %50 = arith.divf %48, %49 : vector<4x32xf32>
    %51 = vector.extract_strided_slice %44 {offsets = [0, 32], sizes = [4, 32], strides = [1, 1]} : vector<4x128xf32> to vector<4x32xf32>
    %52 = arith.negf %51 : vector<4x32xf32>
    %53 = math.exp %52 : vector<4x32xf32>
    %cst_16 = arith.constant 1.000000e+00 : f32
    %54 = vector.broadcast %cst_16 : f32 to vector<4x32xf32>
    %55 = arith.addf %54, %53 : vector<4x32xf32>
    %56 = arith.divf %54, %55 : vector<4x32xf32>
    %57 = vector.extract_strided_slice %44 {offsets = [0, 64], sizes = [4, 32], strides = [1, 1]} : vector<4x128xf32> to vector<4x32xf32>
    %58 = math.tanh %57 : vector<4x32xf32>
    %59 = vector.extract_strided_slice %44 {offsets = [0, 96], sizes = [4, 32], strides = [1, 1]} : vector<4x128xf32> to vector<4x32xf32>
    %60 = arith.negf %59 : vector<4x32xf32>
    %61 = math.exp %60 : vector<4x32xf32>
    %cst_17 = arith.constant 1.000000e+00 : f32
    %62 = vector.broadcast %cst_17 : f32 to vector<4x32xf32>
    %63 = arith.addf %62, %61 : vector<4x32xf32>
    %64 = arith.divf %62, %63 : vector<4x32xf32>
    %65 = arith.mulf %56, %38 : vector<4x32xf32>
    %66 = arith.mulf %50, %58 : vector<4x32xf32>
    %67 = arith.addf %65, %66 : vector<4x32xf32>
    %68 = math.tanh %67 : vector<4x32xf32>
    %69 = arith.mulf %64, %68 : vector<4x32xf32>
    %70 = vector.extract_strided_slice %8 {offsets = [0, 2, 0], sizes = [4, 1, 128], strides = [1, 1, 1]} : vector<4x8x128xf32> to vector<4x1x128xf32>
    %71 = vector.shape_cast %70 : vector<4x1x128xf32> to vector<4x128xf32>
    %cst_18 = arith.constant dense<0.000000e+00> : vector<4x128xf32>
    %72 = tpu.matmul %69, %9, %cst_18 {dimension_numbers = #tpu.dot_dimension_numbers<[1], [0], [0], [1], [0, 0, 1, 1], [], []>} : vector<4x32xf32>, vector<32x128xf32>, vector<4x128xf32> -> vector<4x128xf32>
    %73 = arith.addf %71, %72 : vector<4x128xf32>
    %74 = vector.extract_strided_slice %73 {offsets = [0, 0], sizes = [4, 32], strides = [1, 1]} : vector<4x128xf32> to vector<4x32xf32>
    %75 = arith.negf %74 : vector<4x32xf32>
    %76 = math.exp %75 : vector<4x32xf32>
    %cst_19 = arith.constant 1.000000e+00 : f32
    %77 = vector.broadcast %cst_19 : f32 to vector<4x32xf32>
    %78 = arith.addf %77, %76 : vector<4x32xf32>
    %79 = arith.divf %77, %78 : vector<4x32xf32>
    %80 = vector.extract_strided_slice %73 {offsets = [0, 32], sizes = [4, 32], strides = [1, 1]} : vector<4x128xf32> to vector<4x32xf32>
    %81 = arith.negf %80 : vector<4x32xf32>
    %82 = math.exp %81 : vector<4x32xf32>
    %cst_20 = arith.constant 1.000000e+00 : f32
    %83 = vector.broadcast %cst_20 : f32 to vector<4x32xf32>
    %84 = arith.addf %83, %82 : vector<4x32xf32>
    %85 = arith.divf %83, %84 : vector<4x32xf32>
    %86 = vector.extract_strided_slice %73 {offsets = [0, 64], sizes = [4, 32], strides = [1, 1]} : vector<4x128xf32> to vector<4x32xf32>
    %87 = math.tanh %86 : vector<4x32xf32>
    %88 = vector.extract_strided_slice %73 {offsets = [0, 96], sizes = [4, 32], strides = [1, 1]} : vector<4x128xf32> to vector<4x32xf32>
    %89 = arith.negf %88 : vector<4x32xf32>
    %90 = math.exp %89 : vector<4x32xf32>
    %cst_21 = arith.constant 1.000000e+00 : f32
    %91 = vector.broadcast %cst_21 : f32 to vector<4x32xf32>
    %92 = arith.addf %91, %90 : vector<4x32xf32>
    %93 = arith.divf %91, %92 : vector<4x32xf32>
    %94 = arith.mulf %85, %67 : vector<4x32xf32>
    %95 = arith.mulf %79, %87 : vector<4x32xf32>
    %96 = arith.addf %94, %95 : vector<4x32xf32>
    %97 = math.tanh %96 : vector<4x32xf32>
    %98 = arith.mulf %93, %97 : vector<4x32xf32>
    %99 = vector.extract_strided_slice %8 {offsets = [0, 3, 0], sizes = [4, 1, 128], strides = [1, 1, 1]} : vector<4x8x128xf32> to vector<4x1x128xf32>
    %100 = vector.shape_cast %99 : vector<4x1x128xf32> to vector<4x128xf32>
    %cst_22 = arith.constant dense<0.000000e+00> : vector<4x128xf32>
    %101 = tpu.matmul %98, %9, %cst_22 {dimension_numbers = #tpu.dot_dimension_numbers<[1], [0], [0], [1], [0, 0, 1, 1], [], []>} : vector<4x32xf32>, vector<32x128xf32>, vector<4x128xf32> -> vector<4x128xf32>
    %102 = arith.addf %100, %101 : vector<4x128xf32>
    %103 = vector.extract_strided_slice %102 {offsets = [0, 0], sizes = [4, 32], strides = [1, 1]} : vector<4x128xf32> to vector<4x32xf32>
    %104 = arith.negf %103 : vector<4x32xf32>
    %105 = math.exp %104 : vector<4x32xf32>
    %cst_23 = arith.constant 1.000000e+00 : f32
    %106 = vector.broadcast %cst_23 : f32 to vector<4x32xf32>
    %107 = arith.addf %106, %105 : vector<4x32xf32>
    %108 = arith.divf %106, %107 : vector<4x32xf32>
    %109 = vector.extract_strided_slice %102 {offsets = [0, 32], sizes = [4, 32], strides = [1, 1]} : vector<4x128xf32> to vector<4x32xf32>
    %110 = arith.negf %109 : vector<4x32xf32>
    %111 = math.exp %110 : vector<4x32xf32>
    %cst_24 = arith.constant 1.000000e+00 : f32
    %112 = vector.broadcast %cst_24 : f32 to vector<4x32xf32>
    %113 = arith.addf %112, %111 : vector<4x32xf32>
    %114 = arith.divf %112, %113 : vector<4x32xf32>
    %115 = vector.extract_strided_slice %102 {offsets = [0, 64], sizes = [4, 32], strides = [1, 1]} : vector<4x128xf32> to vector<4x32xf32>
    %116 = math.tanh %115 : vector<4x32xf32>
    %117 = vector.extract_strided_slice %102 {offsets = [0, 96], sizes = [4, 32], strides = [1, 1]} : vector<4x128xf32> to vector<4x32xf32>
    %118 = arith.negf %117 : vector<4x32xf32>
    %119 = math.exp %118 : vector<4x32xf32>
    %cst_25 = arith.constant 1.000000e+00 : f32
    %120 = vector.broadcast %cst_25 : f32 to vector<4x32xf32>
    %121 = arith.addf %120, %119 : vector<4x32xf32>
    %122 = arith.divf %120, %121 : vector<4x32xf32>
    %123 = arith.mulf %114, %96 : vector<4x32xf32>
    %124 = arith.mulf %108, %116 : vector<4x32xf32>
    %125 = arith.addf %123, %124 : vector<4x32xf32>
    %126 = math.tanh %125 : vector<4x32xf32>
    %127 = arith.mulf %122, %126 : vector<4x32xf32>
    %128 = vector.extract_strided_slice %8 {offsets = [0, 4, 0], sizes = [4, 1, 128], strides = [1, 1, 1]} : vector<4x8x128xf32> to vector<4x1x128xf32>
    %129 = vector.shape_cast %128 : vector<4x1x128xf32> to vector<4x128xf32>
    %cst_26 = arith.constant dense<0.000000e+00> : vector<4x128xf32>
    %130 = tpu.matmul %127, %9, %cst_26 {dimension_numbers = #tpu.dot_dimension_numbers<[1], [0], [0], [1], [0, 0, 1, 1], [], []>} : vector<4x32xf32>, vector<32x128xf32>, vector<4x128xf32> -> vector<4x128xf32>
    %131 = arith.addf %129, %130 : vector<4x128xf32>
    %132 = vector.extract_strided_slice %131 {offsets = [0, 0], sizes = [4, 32], strides = [1, 1]} : vector<4x128xf32> to vector<4x32xf32>
    %133 = arith.negf %132 : vector<4x32xf32>
    %134 = math.exp %133 : vector<4x32xf32>
    %cst_27 = arith.constant 1.000000e+00 : f32
    %135 = vector.broadcast %cst_27 : f32 to vector<4x32xf32>
    %136 = arith.addf %135, %134 : vector<4x32xf32>
    %137 = arith.divf %135, %136 : vector<4x32xf32>
    %138 = vector.extract_strided_slice %131 {offsets = [0, 32], sizes = [4, 32], strides = [1, 1]} : vector<4x128xf32> to vector<4x32xf32>
    %139 = arith.negf %138 : vector<4x32xf32>
    %140 = math.exp %139 : vector<4x32xf32>
    %cst_28 = arith.constant 1.000000e+00 : f32
    %141 = vector.broadcast %cst_28 : f32 to vector<4x32xf32>
    %142 = arith.addf %141, %140 : vector<4x32xf32>
    %143 = arith.divf %141, %142 : vector<4x32xf32>
    %144 = vector.extract_strided_slice %131 {offsets = [0, 64], sizes = [4, 32], strides = [1, 1]} : vector<4x128xf32> to vector<4x32xf32>
    %145 = math.tanh %144 : vector<4x32xf32>
    %146 = vector.extract_strided_slice %131 {offsets = [0, 96], sizes = [4, 32], strides = [1, 1]} : vector<4x128xf32> to vector<4x32xf32>
    %147 = arith.negf %146 : vector<4x32xf32>
    %148 = math.exp %147 : vector<4x32xf32>
    %cst_29 = arith.constant 1.000000e+00 : f32
    %149 = vector.broadcast %cst_29 : f32 to vector<4x32xf32>
    %150 = arith.addf %149, %148 : vector<4x32xf32>
    %151 = arith.divf %149, %150 : vector<4x32xf32>
    %152 = arith.mulf %143, %125 : vector<4x32xf32>
    %153 = arith.mulf %137, %145 : vector<4x32xf32>
    %154 = arith.addf %152, %153 : vector<4x32xf32>
    %155 = math.tanh %154 : vector<4x32xf32>
    %156 = arith.mulf %151, %155 : vector<4x32xf32>
    %157 = vector.extract_strided_slice %8 {offsets = [0, 5, 0], sizes = [4, 1, 128], strides = [1, 1, 1]} : vector<4x8x128xf32> to vector<4x1x128xf32>
    %158 = vector.shape_cast %157 : vector<4x1x128xf32> to vector<4x128xf32>
    %cst_30 = arith.constant dense<0.000000e+00> : vector<4x128xf32>
    %159 = tpu.matmul %156, %9, %cst_30 {dimension_numbers = #tpu.dot_dimension_numbers<[1], [0], [0], [1], [0, 0, 1, 1], [], []>} : vector<4x32xf32>, vector<32x128xf32>, vector<4x128xf32> -> vector<4x128xf32>
    %160 = arith.addf %158, %159 : vector<4x128xf32>
    %161 = vector.extract_strided_slice %160 {offsets = [0, 0], sizes = [4, 32], strides = [1, 1]} : vector<4x128xf32> to vector<4x32xf32>
    %162 = arith.negf %161 : vector<4x32xf32>
    %163 = math.exp %162 : vector<4x32xf32>
    %cst_31 = arith.constant 1.000000e+00 : f32
    %164 = vector.broadcast %cst_31 : f32 to vector<4x32xf32>
    %165 = arith.addf %164, %163 : vector<4x32xf32>
    %166 = arith.divf %164, %165 : vector<4x32xf32>
    %167 = vector.extract_strided_slice %160 {offsets = [0, 32], sizes = [4, 32], strides = [1, 1]} : vector<4x128xf32> to vector<4x32xf32>
    %168 = arith.negf %167 : vector<4x32xf32>
    %169 = math.exp %168 : vector<4x32xf32>
    %cst_32 = arith.constant 1.000000e+00 : f32
    %170 = vector.broadcast %cst_32 : f32 to vector<4x32xf32>
    %171 = arith.addf %170, %169 : vector<4x32xf32>
    %172 = arith.divf %170, %171 : vector<4x32xf32>
    %173 = vector.extract_strided_slice %160 {offsets = [0, 64], sizes = [4, 32], strides = [1, 1]} : vector<4x128xf32> to vector<4x32xf32>
    %174 = math.tanh %173 : vector<4x32xf32>
    %175 = vector.extract_strided_slice %160 {offsets = [0, 96], sizes = [4, 32], strides = [1, 1]} : vector<4x128xf32> to vector<4x32xf32>
    %176 = arith.negf %175 : vector<4x32xf32>
    %177 = math.exp %176 : vector<4x32xf32>
    %cst_33 = arith.constant 1.000000e+00 : f32
    %178 = vector.broadcast %cst_33 : f32 to vector<4x32xf32>
    %179 = arith.addf %178, %177 : vector<4x32xf32>
    %180 = arith.divf %178, %179 : vector<4x32xf32>
    %181 = arith.mulf %172, %154 : vector<4x32xf32>
    %182 = arith.mulf %166, %174 : vector<4x32xf32>
    %183 = arith.addf %181, %182 : vector<4x32xf32>
    %184 = math.tanh %183 : vector<4x32xf32>
    %185 = arith.mulf %180, %184 : vector<4x32xf32>
    %186 = vector.extract_strided_slice %8 {offsets = [0, 6, 0], sizes = [4, 1, 128], strides = [1, 1, 1]} : vector<4x8x128xf32> to vector<4x1x128xf32>
    %187 = vector.shape_cast %186 : vector<4x1x128xf32> to vector<4x128xf32>
    %cst_34 = arith.constant dense<0.000000e+00> : vector<4x128xf32>
    %188 = tpu.matmul %185, %9, %cst_34 {dimension_numbers = #tpu.dot_dimension_numbers<[1], [0], [0], [1], [0, 0, 1, 1], [], []>} : vector<4x32xf32>, vector<32x128xf32>, vector<4x128xf32> -> vector<4x128xf32>
    %189 = arith.addf %187, %188 : vector<4x128xf32>
    %190 = vector.extract_strided_slice %189 {offsets = [0, 0], sizes = [4, 32], strides = [1, 1]} : vector<4x128xf32> to vector<4x32xf32>
    %191 = arith.negf %190 : vector<4x32xf32>
    %192 = math.exp %191 : vector<4x32xf32>
    %cst_35 = arith.constant 1.000000e+00 : f32
    %193 = vector.broadcast %cst_35 : f32 to vector<4x32xf32>
    %194 = arith.addf %193, %192 : vector<4x32xf32>
    %195 = arith.divf %193, %194 : vector<4x32xf32>
    %196 = vector.extract_strided_slice %189 {offsets = [0, 32], sizes = [4, 32], strides = [1, 1]} : vector<4x128xf32> to vector<4x32xf32>
    %197 = arith.negf %196 : vector<4x32xf32>
    %198 = math.exp %197 : vector<4x32xf32>
    %cst_36 = arith.constant 1.000000e+00 : f32
    %199 = vector.broadcast %cst_36 : f32 to vector<4x32xf32>
    %200 = arith.addf %199, %198 : vector<4x32xf32>
    %201 = arith.divf %199, %200 : vector<4x32xf32>
    %202 = vector.extract_strided_slice %189 {offsets = [0, 64], sizes = [4, 32], strides = [1, 1]} : vector<4x128xf32> to vector<4x32xf32>
    %203 = math.tanh %202 : vector<4x32xf32>
    %204 = vector.extract_strided_slice %189 {offsets = [0, 96], sizes = [4, 32], strides = [1, 1]} : vector<4x128xf32> to vector<4x32xf32>
    %205 = arith.negf %204 : vector<4x32xf32>
    %206 = math.exp %205 : vector<4x32xf32>
    %cst_37 = arith.constant 1.000000e+00 : f32
    %207 = vector.broadcast %cst_37 : f32 to vector<4x32xf32>
    %208 = arith.addf %207, %206 : vector<4x32xf32>
    %209 = arith.divf %207, %208 : vector<4x32xf32>
    %210 = arith.mulf %201, %183 : vector<4x32xf32>
    %211 = arith.mulf %195, %203 : vector<4x32xf32>
    %212 = arith.addf %210, %211 : vector<4x32xf32>
    %213 = math.tanh %212 : vector<4x32xf32>
    %214 = arith.mulf %209, %213 : vector<4x32xf32>
    %215 = vector.extract_strided_slice %8 {offsets = [0, 7, 0], sizes = [4, 1, 128], strides = [1, 1, 1]} : vector<4x8x128xf32> to vector<4x1x128xf32>
    %216 = vector.shape_cast %215 : vector<4x1x128xf32> to vector<4x128xf32>
    %cst_38 = arith.constant dense<0.000000e+00> : vector<4x128xf32>
    %217 = tpu.matmul %214, %9, %cst_38 {dimension_numbers = #tpu.dot_dimension_numbers<[1], [0], [0], [1], [0, 0, 1, 1], [], []>} : vector<4x32xf32>, vector<32x128xf32>, vector<4x128xf32> -> vector<4x128xf32>
    %218 = arith.addf %216, %217 : vector<4x128xf32>
    %219 = vector.extract_strided_slice %218 {offsets = [0, 0], sizes = [4, 32], strides = [1, 1]} : vector<4x128xf32> to vector<4x32xf32>
    %220 = arith.negf %219 : vector<4x32xf32>
    %221 = math.exp %220 : vector<4x32xf32>
    %cst_39 = arith.constant 1.000000e+00 : f32
    %222 = vector.broadcast %cst_39 : f32 to vector<4x32xf32>
    %223 = arith.addf %222, %221 : vector<4x32xf32>
    %224 = arith.divf %222, %223 : vector<4x32xf32>
    %225 = vector.extract_strided_slice %218 {offsets = [0, 32], sizes = [4, 32], strides = [1, 1]} : vector<4x128xf32> to vector<4x32xf32>
    %226 = arith.negf %225 : vector<4x32xf32>
    %227 = math.exp %226 : vector<4x32xf32>
    %cst_40 = arith.constant 1.000000e+00 : f32
    %228 = vector.broadcast %cst_40 : f32 to vector<4x32xf32>
    %229 = arith.addf %228, %227 : vector<4x32xf32>
    %230 = arith.divf %228, %229 : vector<4x32xf32>
    %231 = vector.extract_strided_slice %218 {offsets = [0, 64], sizes = [4, 32], strides = [1, 1]} : vector<4x128xf32> to vector<4x32xf32>
    %232 = math.tanh %231 : vector<4x32xf32>
    %233 = vector.extract_strided_slice %218 {offsets = [0, 96], sizes = [4, 32], strides = [1, 1]} : vector<4x128xf32> to vector<4x32xf32>
    %234 = arith.negf %233 : vector<4x32xf32>
    %235 = math.exp %234 : vector<4x32xf32>
    %cst_41 = arith.constant 1.000000e+00 : f32
    %236 = vector.broadcast %cst_41 : f32 to vector<4x32xf32>
    %237 = arith.addf %236, %235 : vector<4x32xf32>
    %238 = arith.divf %236, %237 : vector<4x32xf32>
    %239 = arith.mulf %230, %212 : vector<4x32xf32>
    %240 = arith.mulf %224, %232 : vector<4x32xf32>
    %241 = arith.addf %239, %240 : vector<4x32xf32>
    %242 = math.tanh %241 : vector<4x32xf32>
    %243 = arith.mulf %238, %242 : vector<4x32xf32>
    %244 = vector.shape_cast %40 : vector<4x32xf32> to vector<4x1x32xf32>
    %245 = vector.shape_cast %69 : vector<4x32xf32> to vector<4x1x32xf32>
    %246 = vector.shape_cast %98 : vector<4x32xf32> to vector<4x1x32xf32>
    %247 = vector.shape_cast %127 : vector<4x32xf32> to vector<4x1x32xf32>
    %248 = vector.shape_cast %156 : vector<4x32xf32> to vector<4x1x32xf32>
    %249 = vector.shape_cast %185 : vector<4x32xf32> to vector<4x1x32xf32>
    %250 = vector.shape_cast %214 : vector<4x32xf32> to vector<4x1x32xf32>
    %251 = vector.shape_cast %243 : vector<4x32xf32> to vector<4x1x32xf32>
    %252 = tpu.concatenate %244, %245, %246, %247, %248, %249, %250, %251 in 1 : vector<4x1x32xf32>, vector<4x1x32xf32>, vector<4x1x32xf32>, vector<4x1x32xf32>, vector<4x1x32xf32>, vector<4x1x32xf32>, vector<4x1x32xf32>, vector<4x1x32xf32> -> vector<4x8x32xf32>
    %253 = vector.shape_cast %252 : vector<4x8x32xf32> to vector<32x32xf32>
    %c0_42 = arith.constant 0 : index
    %c0_43 = arith.constant 0 : index
    %254 = vector.load %arg5[%c0_42, %c0_43] : memref<32x8xf32, #tpu.memory_space<vmem>>, vector<32x8xf32>
    %cst_44 = arith.constant dense<0.000000e+00> : vector<32x8xf32>
    %255 = tpu.matmul %253, %254, %cst_44 {dimension_numbers = #tpu.dot_dimension_numbers<[1], [0], [0], [1], [0, 0, 1, 1], [], []>} : vector<32x32xf32>, vector<32x8xf32>, vector<32x8xf32> -> vector<32x8xf32>
    %c0_45 = arith.constant 0 : index
    %c0_46 = arith.constant 0 : index
    %256 = vector.load %arg6[%c0_45, %c0_46] : memref<1x8xf32, #tpu.memory_space<vmem>>, vector<1x8xf32>
    %257 = vector.broadcast %256 : vector<1x8xf32> to vector<32x8xf32>
    %258 = arith.addf %255, %257 : vector<32x8xf32>
    %259 = vector.shape_cast %258 : vector<32x8xf32> to vector<4x8x8xf32>
    %c0_47 = arith.constant 0 : index
    %c0_48 = arith.constant 0 : index
    %c0_49 = arith.constant 0 : index
    %260 = vector.load %arg7[%c0_47, %c0_48, %c0_49] : memref<4x8x8xf32, #tpu.memory_space<vmem>>, vector<4x8x8xf32>
    tpu.vector_store %arg7[%c0_47, %c0_48, %c0_49], %259 {strides = array<i32>} : memref<4x8x8xf32, #tpu.memory_space<vmem>>, vector<4x8x8xf32>,
    return
  }
  func.func @transform_0(%arg0: i32) -> (i32, i32, i32) {
    %c0_i32 = arith.constant 0 : i32
    %c0_i32_0 = arith.constant 0 : i32
    %c0_i32_1 = arith.constant 0 : i32
    return %arg0, %c0_i32, %c0_i32_0 : i32, i32, i32
  }
  func.func @transform_1(%arg0: i32) -> (i32, i32) {
    %c0_i32 = arith.constant 0 : i32
    %c0_i32_0 = arith.constant 0 : i32
    %c0_i32_1 = arith.constant 0 : i32
    return %c0_i32, %c0_i32_0 : i32, i32
  }
  func.func @transform_2(%arg0: i32) -> (i32, i32) {
    %c0_i32 = arith.constant 0 : i32
    %c0_i32_0 = arith.constant 0 : i32
    %c0_i32_1 = arith.constant 0 : i32
    return %c0_i32, %c0_i32_0 : i32, i32
  }
  func.func @transform_3(%arg0: i32) -> (i32, i32) {
    %c0_i32 = arith.constant 0 : i32
    %c0_i32_0 = arith.constant 0 : i32
    %c0_i32_1 = arith.constant 0 : i32
    return %c0_i32, %c0_i32_0 : i32, i32
  }
  func.func @transform_4(%arg0: i32) -> (i32, i32) {
    %c0_i32 = arith.constant 0 : i32
    %c0_i32_0 = arith.constant 0 : i32
    %c0_i32_1 = arith.constant 0 : i32
    return %c0_i32, %c0_i32_0 : i32, i32
  }
  func.func @transform_5(%arg0: i32) -> (i32, i32) {
    %c0_i32 = arith.constant 0 : i32
    %c0_i32_0 = arith.constant 0 : i32
    %c0_i32_1 = arith.constant 0 : i32
    return %c0_i32, %c0_i32_0 : i32, i32
  }
  func.func @transform_6(%arg0: i32) -> (i32, i32, i32) {
    %c0_i32 = arith.constant 0 : i32
    %c0_i32_0 = arith.constant 0 : i32
    %c0_i32_1 = arith.constant 0 : i32
    return %arg0, %c0_i32, %c0_i32_0 : i32, i32, i32
  }
}

</mosaic_0001>

<bundles_post_ra>
// kernel: tpu_custom_call.1
= control target key start
LH: loop header
LB: loop body
LE: loop exit
PB: predicated region body
PF: predicated region fallthrough
CT: control target
= control target key end

     0   :  { %11 = vsyncpa [#allocation3], 0  ;;  %s3446_s0 = inlined_call_operand.hbm [shape: f32[8,8,16], index: 0, kind: input, shape index: {}]   ;;  %s3447_s1 = inlined_call_operand.hbm [shape: f32[16,128], index: 1, kind: input, shape index: {}]   ;;  %s3448_s2 = inlined_call_operand.vmem [shape: f32[32,128], index: 2, kind: input, shape index: {}]   ;;  %s3449_s3 = inlined_call_operand.vmem [shape: f32[1,128], index: 3, kind: input, shape index: {}]   ;;  %s3450_s4 = inlined_call_operand.vmem [shape: f32[32,8], index: 4, kind: input, shape index: {}]   ;;  %s3451_s5 = inlined_call_operand.vmem [shape: f32[1,8], index: 5, kind: input, shape index: {}]   ;;  %s3452_s6 = inlined_call_operand.hbm [shape: f32[8,8,8], index: 6, kind: output, shape index: {}]  }
   0x1   :  { %13 = vsyncpa [#allocation3 + $0x1], 0 }
   0x2   :  { %14 = vsyncpa [#allocation6], 0 }
   0x3   :  { %15 = vsyncpa [#allocation4], 0 }
   0x4   :  { %17 = vsyncpa [#allocation4 + $0x1], 0  ;;  %s2749_s21 = smov 0   ;;  %s2751_s22 = smov 0  }
   0x5   :  { %s2753_s23 = smov 0   ;;  %s2755_s24 = smov 0  }
   0x6 LB: > { %s2770_s25 = sadd.s32 4294967295, %s2704_s24   ;;  %s2183_s26 = sadd.s32 4294967294, %s2704_s24   ;;  %s2704_s24 = sphi %s2755_s24, %s3466_s24   ;;  %s2700_s23 = sphi %s2753_s23, %s3465_s23   ;;  %s2696_s22 = sphi %s2751_s22, %s3464_s22   ;;  %s2692_s21 = sphi %s2749_s21, %s3463_s21  }
   0x7   : > { %p43_p0 = scmp.ne.s32.totalorder %s2696_s22, %s2692_s21  ;;  %p44_p1 = scmp.eq.s32.totalorder %s2770_s25, 0 }
   0x8   : > { %p172_p2 = scmp.eq.s32.totalorder %s2770_s25, 1  ;;  %p178_p3 = scmp.eq.s32.totalorder %s2183_s26, 1 }
   0x9   : > { %p2779_p4 = por %p44_p1, %p43_p0  ;;  %p2184_p5 = scmp.ge.s32.totalorder %s2704_s24, 1 }
   0xa   : > { %p2784_p6 = por %p178_p3, %p43_p0  ;;  %p185_p7 = scmp.lt.s32.totalorder %s2704_s24, 3 }
   0xb   : > { %s196_s7 = sshll.u32 %s3447_s1, 4  ;;  %s2706_s9 = smov [#allocation5]   ;;  %s197_s7 = int_to_ptr.hbm [resolvable:$true] %s196_s7 }
   0xc   : > { %p2792_p8 = pnand %p2184_p5, %p185_p7  ;;  %s198_s10 = sshll.u32 %s2706_s9, 4  ;;  %s199_s10 = int_to_ptr.vmem [resolvable:$true] %s198_s10 }
   0xd   : > { %s2802_s11 = sadd.s32 1, %s2704_s24   ;;  %s3453_s12 = smov 128  }
   0xe   : > { %p2256_p9 = pneg %p2792_p8  ;;  %s3454_s13 = smov 8  }
   0xf   : > { %s27_s14 = ssub.s32 %s2704_s24, %s2802_s11  ;;  %s30_s15 = sadd.s32 1, %s2700_s23 }
  0x10   : > { %p2257_p10 = pnand %p2256_p9, %p44_p1  ;;  %p28_p12 = scmp.eq.s32.totalorder %s27_s14, 0 }
  0x11   : > { %p37_p13 = scmp.ne.s32.totalorder %s2700_s23, %s2696_s22  ;;  %p38_p0 = scmp.eq.s32.totalorder %s2704_s24, 0 }
  0x12   : > { %2259 = dma.hbm_to_vmem [thread:$0]  (!%p2257_p10), %s197_s7, 256, %s199_s10, [#allocation6], %s3453_s12, %s3453_s12, %s3454_s13  }
  0x13   : > { %s2814_s16 = scalar_select %p28_p12, %s2700_s23, %s30_s15  }
  0x14   : > { %p2818_p3 = por %p172_p2, %p37_p13  ;;  %p2269_p5 = scmp.lt.s32.totalorder %s2704_s24, 2 }
  0x15   : > { %s224_s18 = sand.u32 1, %s2700_s23   ;;  %s2246_s19 = sshll.u32 %s2704_s24, 5 }
  0x16   : > { %p39_p7 = por %p38_p0, %p37_p13  ;;  %s2187_s20 = sshll.u32 %s224_s18, 5 }
  0x17   : > { %s233_s30 = scalar_lea.hbm %s3446_s0, %s2246_s19  ;;  %s228_s9 = scalar_lea.vmem [#allocation2], %s2187_s20 }
  0x18   : > { %s234_s7 = sshll.u32 %s233_s30, 4  ;;  %s236_s10 = sshll.u32 %s228_s9, 4  ;;  %s235_s7 = int_to_ptr.hbm [resolvable:$true] %s234_s7  ;;  %s237_s10 = int_to_ptr.vmem [resolvable:$true] %s236_s10 }
  0x19   : > { %p2828_p9 = pnand %p2269_p5, %p39_p7  ;;  %s225_s15 = scalar_lea.sflag [#allocation3], %s224_s18 }
  0x1a   : > { %s2604_s12 = sshra.s32 %s235_s7, 4  ;;  %s2611_s20 = scalar_lea.hbm %s3446_s0, 64  ;;  %s2605_s12 = int_to_ptr.hbm [resolvable:$true] %s2604_s12 }
  0x1b   : > { %s2606_s13 = scalar_lea.hbm %s2605_s12, 32  ;;  %p2608_p10 = pneg %p2828_p9 }
  0x1c   : > { %p2607_p2 = scmp.ne.s32.totalorder %s2605_s12, %s2606_s13  ;;  %p2612_p0 = scmp.lt.s32.totalorder %s2605_s12, %s3446_s0 }
  0x1d   : > { %p2613_p5 = scmp.lt.s32.totalorder %s2611_s20, %s2606_s13 }
  0x1e   : > { %p2609_p12 = pnand %p2608_p10, %p2607_p2 }
  0x1f   : > { %p2614_p7 = por %p2613_p5, %p2612_p0 }
  0x20   : > { %p2610_p13 = pneg %p2609_p12 }
  0x22   : > { %p2615_p11 = pnand %p2614_p7, %p2610_p13 }
  0x24   : > { %2618 = shalt.err (!%p2615_p11)
}
  0x25   : > { %s3460_s18 = smov 8   ;;  %s3461_s9 = smov 128  }
  0x26   : > { %2263 = dma.hbm_to_vmem [thread:$0]  (!%p2828_p9), %s235_s7, 512, %s237_s10, %s225_s15, %s3461_s9, %s3461_s9, %s3460_s18  }
  0x27   : > { %248 = sbr.rel (%p2792_p8) target bundleno = 4970 (0x136a), region = 44  ;;  %s2848_s19 = sand.u32 (!%p2792_p8), 1, %s2696_s22  }
  0x28   : > { %s2191_s12 = sshll.u32 (!%p2792_p8), %s2848_s19, 5  ;;  %s251_s13 = scalar_lea.sflag (!%p2792_p8), [#allocation3], %s2848_s19 }
  0x29   : > { %s2854_s26 = scalar_lea.vmem (!%p2792_p8), [#allocation2], %s2191_s12 }
  0x2c   : > { %2679 = dma.done.wait (%p2779_p4), %s251_s13, 512  }
  0x2d   : > { %2681 = vsyncadd (%p2779_p4), %s251_s13, 4294966784 }
  0x2e   : > { %2683 = dma.done.wait (%p44_p1), [#allocation6], 256  }
  0x2f   : > { %2685 = vsyncadd (%p44_p1), [#allocation6], 4294967040  ;;  %v296_v0 = vld [vmem:[#allocation5 + $0x8] sm:$0xff]  ;;  %v2867_v1 = vld [vmem:[%s3448_s2 + $0x18] sm:$0xff]  ;;  %vm297_vm0 = vcmask 130048   ;;  %v2709_v7 = vmov 0.0  }
  0x30   : > { %v295_v2 = vld [vmem:[#allocation5] sm:$0xff]  ;;  %324 = vmatpush.msra.mxu0 %v296_v0  ;;  %367 = vmatpush.msra.mxu1 %v2867_v1  ;;  %v2873_v3 = vld [vmem:[%s3448_s2 + $0x10] sm:$0xff]  ;;  %v2879_v5 = vld [vmem:[%s3448_s2 + $0x8] sm:$0xff]  ;;  %s2710_s9 = smov 64   ;;  %s2711_s13 = smov 32  }
  0x31   : > { %v291_v4 = vld [vmem:[%s2854_s26] sm:$0xff]  ;;  %564 = vmatpush.msra.mxu2 %v2867_v1  ;;  %v292_v8 = vld [vmem:[%s2854_s26 + $0x8] sm:$0xff]  ;;  %v293_v9 = vld [vmem:[%s2854_s26 + $0x10] sm:$0xff]  ;;  %s288_s14 = scalar_lea.vmem [#allocation7], %s2191_s12  ;;  %s2247_s15 = sshll.u32 %s2770_s25, 5 }
  0x32   : > { %325 = vmatpush.msra.mxu0 %v295_v2  ;;  %368 = vmatpush.msra.mxu1 %v2873_v3  ;;  %v2887_v6 = vld [vmem:[%s3448_s2] sm:$0xff]  ;;  %v294_v10 = vld [vmem:[%s2854_s26 + $0x18] sm:$0xff]  ;;  %s2096_s30 = scalar_lea.hbm %s3452_s6, %s2247_s15  ;;  %s2097_s18 = sshll.u32 %s288_s14, 4  ;;  %s2098_s18 = int_to_ptr.vmem [resolvable:$true] %s2097_s18 }
  0x33   : > { %2194 = vmatmul.msk.f32.vlgmr.msra.gmra.mxu0 %vm297_vm0, %v291_v4  ;;  %565 = vmatpush.msra.mxu2 %v2873_v3  ;;  %v2312_v11 = vld [vmem:[%s3449_s3] ss:$0 sm:$0xff]  ;;  %s2085_s12 = scalar_lea.sflag [#allocation4], %s2848_s19  ;;  %s2654_s10 = scalar_lea.hbm %s3452_s6, 64 }
  0x34   : > { %369 = vmatpush.msra.mxu1 %v2879_v5 }
  0x35   : > { %566 = vmatpush.msra.mxu2 %v2879_v5 }
  0x36   : > { %370 = vmatpush.msra.mxu1 %v2887_v6 }
  0x37   : > { %371 = vmatmul.f32.vlgmr.msra.gmra.mxu1 %v2709_v7  ;;  %567 = vmatpush.msra.mxu2 %v2887_v6 }
  0x38   : > { %770 = vmatpush.msrb.mxu1 %v2867_v1 }
  0x39   : > { %1182 = vmatpush.msrb.mxu2 %v2867_v1 }
  0x3a   : > { %771 = vmatpush.msrb.mxu1 %v2873_v3 }
  0x3b   : > { %1183 = vmatpush.msrb.mxu2 %v2873_v3  ;;  %2195 = vmatmul.msk.f32.gmra.mxu0 %vm297_vm0, %v292_v8 }
  0x3c   : > { %772 = vmatpush.msrb.mxu1 %v2879_v5 }
  0x3d   : > { %1184 = vmatpush.msrb.mxu2 %v2879_v5 }
  0x3e   : > { %773 = vmatpush.msrb.mxu1 %v2887_v6 }
  0x3f   : > { %1185 = vmatpush.msrb.mxu2 %v2887_v6 }
  0x40   : > { %976 = vmatpush.msra.mxu1 %v2867_v1 }
  0x42   : > { %977 = vmatpush.msra.mxu1 %v2873_v3 }
  0x43   : > { %2196 = vmatmul.msk.f32.gmra.mxu0 %vm297_vm0, %v293_v9 }
  0x44   : > { %978 = vmatpush.msra.mxu1 %v2879_v5 }
  0x46   : > { %979 = vmatpush.msra.mxu1 %v2887_v6 }
  0x4b   : > { %2197 = vmatmul.msk.f32.gmra.mxu0 %vm297_vm0, %v294_v10 }
  0xb0   : > { %v327_v12 = vpop.f32.mrf.mxu0 }
  0xb1   : > { %v2915_v13 = vadd.f32 %v2312_v11, %v327_v12 }
  0xb4   : > { %v372_v14 = vpop.f32.mrf.mxu1 }
  0xb5   : > { %v383_v15 = vadd.f32 %v372_v14, %v2915_v13  ;;  %v376_v17 = vrot.slane %v372_v14, 1  ;;  %v377_v22 = vrot.slane %v372_v14, 2  ;;  %v378_v27 = vrot.slane %v372_v14, 3 }
  0xb7   : > { %2314 = vtanh.f32 %v383_v15  ;;  %v2198_v32 = vmul.f32 -1.442695, %v383_v15 }
  0xb8   : > { %v330_v16 = vpop.f32.mrf.mxu0 }
  0xb9   : > { %v2918_v18 = vadd.f32 %v2312_v11, %v330_v16 }
  0xbb   : > { %v384_v19 = vadd.f32 %v376_v17, %v2918_v18 }
  0xbd   : > { %v2315_v20 = vpop.eup %2314  ;;  %2316 = vtanh.f32 %v384_v19  ;;  %v2199_v33 = vmul.f32 -1.442695, %v384_v19 }
  0xbe   : > { %475 = vrot.lane.b32.xlu1 %v2315_v20, %s2710_s9 }
  0xc0   : > { %v333_v21 = vpop.f32.mrf.mxu0 }
  0xc1   : > { %v2922_v23 = vadd.f32 %v2312_v11, %v333_v21 }
  0xc3   : > { %v2317_v24 = vpop.eup %2316  ;;  %v385_v25 = vadd.f32 %v377_v22, %v2922_v23 }
  0xc4   : > { %477 = vrot.lane.b32.xlu0 %v2317_v24, %s2710_s9 }
  0xc5   : > { %2318 = vtanh.f32 %v385_v25  ;;  %v2200_v36 = vmul.f32 -1.442695, %v385_v25 }
  0xc8   : > { %v336_v26 = vpop.f32.mrf.mxu0 }
  0xc9   : > { %v2926_v28 = vadd.f32 %v2312_v11, %v336_v26 }
  0xcb   : > { %v2319_v29 = vpop.eup %2318  ;;  %v386_v30 = vadd.f32 %v378_v27, %v2926_v28 }
  0xcc   : > { %479 = vrot.lane.b32.xlu0 %v2319_v29, %s2710_s9 }
  0xcd   : > { %2320 = vtanh.f32 %v386_v30  ;;  %v2201_v39 = vmul.f32 -1.442695, %v386_v30 }
  0xce   : > { %2322 = vpow2.f32 %v2198_v32 }
  0xcf   : > { %2324 = vpow2.f32 %v2199_v33 }
  0xd3   : > { %v2321_v31 = vpop.eup %2320 }
  0xd4   : > { %481 = vrot.lane.b32.xlu1 %v2321_v31, %s2710_s9  ;;  %v2323_v34 = vpop.eup %2322 }
  0xd5   : > { %v399_v35 = vadd.f32 1.0, %v2323_v34  ;;  %v2325_v37 = vpop.eup %2324 }
  0xd6   : > { %v400_v38 = vadd.f32 1.0, %v2325_v37 }
  0xd7   : > { %2326 = vrcp.f32 %v399_v35  ;;  %v414_v53 = vand.u32 2147483648, %v399_v35  ;;  %vm408_vm2 = vweird.f32 %v399_v35  ;;  %v412_v54 = vand.u32 2147483647, %v399_v35 }
  0xd8   : > { %2328 = vpow2.f32 %v2200_v36  ;;  %v429_v0 = vand.u32 2147483648, %v400_v38  ;;  %vm423_vm6 = vweird.f32 %v400_v38  ;;  %v427_v4 = vand.u32 2147483647, %v400_v38 }
  0xd9   : > { %2330 = vrcp.f32 %v400_v38  ;;  %v415_v58 = vor.u32 1.1754944e-38, %v414_v53  ;;  %vm413_vm4 = vcmp.eq.f32.partialorder %v412_v54, 8.507059e+37 }
  0xda   : > { %2332 = vpow2.f32 %v2201_v39  ;;  %v430_v10 = vor.u32 1.1754944e-38, %v429_v0  ;;  %vm428_vm8 = vcmp.eq.f32.partialorder %v427_v4, 8.507059e+37 }
  0xdd   : > { %v2327_v40 = vpop.eup %2326 }
  0xde   : > { %v2329_v41 = vpop.eup %2328  ;;  %v404_v42 = vmul.f32 %v2327_v40, %v399_v35  ;;  %vm409_vm1 = vweird.f32 %v2327_v40 }
  0xdf   : > { %v401_v43 = vadd.f32 1.0, %v2329_v41  ;;  %v2331_v44 = vpop.eup %2330  ;;  %vm410_vm3 = vmor %vm408_vm2, %vm409_vm1  ;;  %vm540_vm1 = vcmask 1041409   ;;  %vm543_vm2 = vcmask 1042434  }
  0xe0   : > { %v405_v45 = vsub.f32 1.0, %v404_v42  ;;  %v2333_v46 = vpop.eup %2332  ;;  %v419_v47 = vmul.f32 %v2331_v44, %v400_v38  ;;  %vm424_vm5 = vweird.f32 %v2331_v44 }
  0xe1   : > { %2334 = vrcp.f32 %v401_v43  ;;  %v402_v49 = vadd.f32 1.0, %v2333_v46  ;;  %vm425_vm7 = vmor %vm423_vm6, %vm424_vm5  ;;  %v444_v17 = vand.u32 2147483648, %v401_v43  ;;  %vm438_vm10 = vweird.f32 %v401_v43 }
  0xe2   : > { %v406_v48 = vmul.f32 %v2327_v40, %v405_v45  ;;  %v420_v50 = vsub.f32 1.0, %v419_v47  ;;  %v442_v19 = vand.u32 2147483647, %v401_v43 }
  0xe3   : > { %2336 = vrcp.f32 %v402_v49  ;;  %v445_v22 = vor.u32 1.1754944e-38, %v444_v17  ;;  %v459_v29 = vand.u32 2147483648, %v402_v49  ;;  %vm453_vm14 = vweird.f32 %v402_v49 }
  0xe4   : > { %v407_v52 = vadd.f32 %v2327_v40, %v406_v48  ;;  %v421_v55 = vmul.f32 %v2331_v44, %v420_v50  ;;  %vm443_vm12 = vcmp.eq.f32.partialorder %v442_v19, 8.507059e+37  ;;  %v457_v30 = vand.u32 2147483647, %v402_v49 }
  0xe5   : > { %v460_v32 = vor.u32 1.1754944e-38, %v459_v29 }
  0xe6   : > { %v411_v57 = vsel %vm410_vm3, %v2327_v40, %v407_v52  ;;  %v422_v59 = vadd.f32 %v2331_v44, %v421_v55  ;;  %vm458_vm0 = vcmp.eq.f32.partialorder %v457_v30, 8.507059e+37  ;;  %vm546_vm3 = vcmask 1043459  }
  0xe7   : > { %v2335_v51 = vpop.eup %2334  ;;  %v2931_v63 = vsel %vm413_vm4, %v415_v58, %v411_v57  ;;  %vm351_vm4 = vcmask 261120  }
  0xe8   : > { %v434_v56 = vmul.f32 %v2335_v51, %v401_v43  ;;  %v426_v7 = vsel %vm425_vm7, %v2331_v44, %v422_v59  ;;  %vm439_vm9 = vweird.f32 %v2335_v51  ;;  %v467_v44 = vmul.f32 0.0, %v2931_v63 }
  0xe9   : > { %v2337_v61 = vpop.eup %2336  ;;  %v431_v12 = vsel %vm428_vm8, %v430_v10, %v426_v7  ;;  %vm440_vm11 = vmor %vm438_vm10, %vm439_vm9 }
  0xea   : > { %v435_v60 = vsub.f32 1.0, %v434_v56  ;;  %v449_v9 = vmul.f32 %v2337_v61, %v402_v49  ;;  %vm454_vm13 = vweird.f32 %v2337_v61  ;;  %v468_v36 = vmul.f32 0.0, %v431_v12 }
  0xeb   : > { %vm455_vm15 = vmor %vm453_vm14, %vm454_vm13 }
  0xec   : > { %v436_v8 = vmul.f32 %v2335_v51, %v435_v60  ;;  %v450_v16 = vsub.f32 1.0, %v449_v9 }
  0xee   : > { %v437_v15 = vadd.f32 %v2335_v51, %v436_v8  ;;  %v451_v21 = vmul.f32 %v2337_v61, %v450_v16 }
  0xf0   : > { %v441_v20 = vsel %vm440_vm11, %v2335_v51, %v437_v15  ;;  %v452_v27 = vadd.f32 %v2337_v61, %v451_v21 }
  0xf1   : > { %v446_v25 = vsel %vm443_vm12, %v445_v22, %v441_v20 }
  0xf2   : > { %v456_v31 = vsel %vm455_vm15, %v2337_v61, %v452_v27  ;;  %v469_v39 = vmul.f32 0.0, %v446_v25 }
  0xf3   : > { %v461_v34 = vsel %vm458_vm0, %v460_v32, %v456_v31 }
  0xf4   : > { %v470_v48 = vmul.f32 0.0, %v461_v34 }
 0x130   : > { %v476_v62 = vpop.permute.xlu1 %475 }
 0x131   : > { %v487_v2 = vmul.f32 %v476_v62, %v2931_v63 }
 0x133   : > { %495 = vrot.lane.b32.xlu0 %v487_v2, %s2711_s13 }
 0x136   : > { %v478_v11 = vpop.permute.xlu0 %477 }
 0x137   : > { %v488_v14 = vmul.f32 %v478_v11, %v431_v12 }
 0x139   : > { %497 = vrot.lane.b32.xlu2 %v488_v14, %s2711_s13 }
 0x13e   : > { %v480_v24 = vpop.permute.xlu0 %479 }
 0x13f   : > { %v489_v26 = vmul.f32 %v480_v24, %v446_v25 }
 0x141   : > { %499 = vrot.lane.b32.xlu2 %v489_v26, %s2711_s13 }
 0x146   : > { %v482_v33 = vpop.permute.xlu1 %481 }
 0x147   : > { %v490_v35 = vmul.f32 %v482_v33, %v461_v34 }
 0x149   : > { %501 = vrot.lane.b32.xlu1 %v490_v35, %s2711_s13 }
 0x193   : > { %v498_v37 = vpop.permute.xlu2 %497 }
 0x194   : > { %v2938_v38 = vadd.f32 %v498_v37, %v468_v36 }
 0x196   : > { %2338 = vtanh.f32 %v2938_v38 }
 0x19b   : > { %v500_v40 = vpop.permute.xlu2 %499 }
 0x19c   : > { %v2339_v41 = vpop.eup %2338  ;;  %v2941_v42 = vadd.f32 %v500_v40, %v469_v39 }
 0x19d   : > { %521 = vrot.lane.b32.xlu2 %v2339_v41, %s2710_s9 }
 0x19e   : > { %2340 = vtanh.f32 %v2941_v42 }
 0x1a4   : > { %v2341_v43 = vpop.eup %2340 }
 0x1a5   : > { %v496_v45 = vpop.permute.xlu0 %495  ;;  %523 = vrot.lane.b32.xlu0 %v2341_v43, %s2710_s9 }
 0x1a6   : > { %v2947_v46 = vadd.f32 %v496_v45, %v467_v44 }
 0x1a8   : > { %2342 = vtanh.f32 %v2947_v46 }
 0x1ae   : > { %v2343_v47 = vpop.eup %2342 }
 0x1af   : > { %519 = vrot.lane.b32.xlu1 %v2343_v47, %s2710_s9 }
 0x1bb   : > { %v502_v49 = vpop.permute.xlu1 %501 }
 0x1bc   : > { %v2951_v50 = vadd.f32 %v502_v49, %v470_v48 }
 0x1be   : > { %2344 = vtanh.f32 %v2951_v50 }
 0x1c4   : > { %v2345_v51 = vpop.eup %2344 }
 0x1c5   : > { %525 = vrot.lane.b32.xlu2 %v2345_v51, %s2710_s9 }
 0x1f7   : > { %v522_v52 = vpop.permute.xlu2 %521 }
 0x1f8   : > { %v2955_v54 = vmul.f32 %v522_v52, %v431_v12 }
 0x1fa   : > { %v539_v59 = vrot.slane %v2955_v54, 7 }
 0x217   : > { %v524_v53 = vpop.permute.xlu0 %523 }
 0x218   : > { %v2957_v55 = vmul.f32 %v524_v53, %v446_v25 }
 0x21a   : > { %v542_v61 = vrot.slane %v2957_v55, 6 }
 0x21f   : > { %v526_v56 = vpop.permute.xlu2 %525 }
 0x220   : > { %v2959_v57 = vmul.f32 %v526_v56, %v461_v34 }
 0x221   : > { %v520_v58 = vpop.permute.xlu1 %519 }
 0x222   : > { %v2963_v60 = vmul.f32 %v520_v58, %v2931_v63  ;;  %v545_v62 = vrot.slane %v2959_v57, 5 }
 0x224   : > { %v541_v0 = vsel %vm540_vm1, %v539_v59, %v2963_v60 }
 0x225   : > { %v544_v2 = vsel %vm543_vm2, %v542_v61, %v541_v0 }
 0x226   : > { %v547_v4 = vsel %vm546_vm3, %v545_v62, %v544_v2 }
 0x227   : > { %548 = vrot.lane.b32.xlu0 %v547_v4, %s2711_s13 }
 0x299   : > { %v549_v7 = vpop.permute.xlu0 %548 }
 0x29a   : > { %2202 = vmatmul.msk.f32.vlgmr.msra.gmra.mxu2 %vm351_vm4, %v549_v7 }
 0x29b   : > { %1390 = vmatpush.msra.mxu2 %v2867_v1 }
 0x29d   : > { %1391 = vmatpush.msra.mxu2 %v2873_v3 }
 0x29f   : > { %1392 = vmatpush.msra.mxu2 %v2879_v5 }
 0x2a1   : > { %1393 = vmatpush.msra.mxu2 %v2887_v6 }
 0x31d   : > { %v569_v63 = vpop.f32.mrf.mxu2 }
 0x31e   : > { %v573_v8 = vrot.slane %v569_v63, 7  ;;  %v581_v9 = vadd.f32 %v569_v63, %v2918_v18  ;;  %v574_v10 = vrot.slane %v569_v63, 1  ;;  %v575_v12 = vrot.slane %v569_v63, 2 }
 0x320   : > { %v580_v11 = vadd.f32 %v573_v8, %v2915_v13  ;;  %2346 = vtanh.f32 %v581_v9  ;;  %v582_v14 = vadd.f32 %v574_v10, %v2922_v23  ;;  %v583_v16 = vadd.f32 %v575_v12, %v2926_v28 }
 0x321   : > { %v2204_v25 = vmul.f32 -1.442695, %v581_v9 }
 0x322   : > { %2348 = vtanh.f32 %v580_v11  ;;  %v2205_v21 = vmul.f32 -1.442695, %v582_v14  ;;  %v2203_v26 = vmul.f32 -1.442695, %v580_v11  ;;  %v2206_v31 = vmul.f32 -1.442695, %v583_v16 }
 0x323   : > { %2350 = vtanh.f32 %v582_v14 }
 0x324   : > { %2352 = vtanh.f32 %v583_v16 }
 0x325   : > { %2354 = vpow2.f32 %v2205_v21 }
 0x326   : > { %v2347_v15 = vpop.eup %2346 }
 0x327   : > { %686 = vrot.lane.b32.xlu0 %v2347_v15, %s2710_s9 }
 0x328   : > { %v2349_v17 = vpop.eup %2348 }
 0x329   : > { %684 = vrot.lane.b32.xlu1 %v2349_v17, %s2710_s9  ;;  %v2351_v19 = vpop.eup %2350 }
 0x32a   : > { %688 = vrot.lane.b32.xlu2 %v2351_v19, %s2710_s9  ;;  %v2353_v20 = vpop.eup %2352 }
 0x32b   : > { %v2355_v22 = vpop.eup %2354 }
 0x32c   : > { %v598_v24 = vadd.f32 1.0, %v2355_v22 }
 0x32e   : > { %2356 = vrcp.f32 %v598_v24  ;;  %v641_v40 = vand.u32 2147483648, %v598_v24  ;;  %vm635_vm6 = vweird.f32 %v598_v24  ;;  %v639_v41 = vand.u32 2147483647, %v598_v24 }
 0x32f   : > { %2358 = vpow2.f32 %v2204_v25 }
 0x330   : > { %2360 = vpow2.f32 %v2203_v26  ;;  %v642_v48 = vor.u32 1.1754944e-38, %v641_v40  ;;  %vm640_vm8 = vcmp.eq.f32.partialorder %v639_v41, 8.507059e+37 }
 0x331   : > { %690 = vrot.lane.b32.xlu1 %v2353_v20, %s2710_s9  ;;  %2362 = vpow2.f32 %v2206_v31 }
 0x334   : > { %v2357_v27 = vpop.eup %2356 }
 0x335   : > { %v631_v29 = vmul.f32 %v2357_v27, %v598_v24  ;;  %v2359_v30 = vpop.eup %2358  ;;  %vm636_vm5 = vweird.f32 %v2357_v27 }
 0x336   : > { %v2361_v32 = vpop.eup %2360  ;;  %v597_v34 = vadd.f32 1.0, %v2359_v30  ;;  %vm637_vm7 = vmor %vm635_vm6, %vm636_vm5 }
 0x337   : > { %v632_v33 = vsub.f32 1.0, %v631_v29  ;;  %v596_v35 = vadd.f32 1.0, %v2361_v32  ;;  %v2363_v37 = vpop.eup %2362 }
 0x338   : > { %2364 = vrcp.f32 %v597_v34  ;;  %v599_v44 = vadd.f32 1.0, %v2363_v37  ;;  %vm620_vm10 = vweird.f32 %v597_v34  ;;  %v626_v7 = vand.u32 2147483648, %v597_v34 }
 0x339   : > { %v633_v36 = vmul.f32 %v2357_v27, %v632_v33  ;;  %2366 = vrcp.f32 %v596_v35  ;;  %v624_v63 = vand.u32 2147483647, %v597_v34  ;;  %v611_v10 = vand.u32 2147483648, %v596_v35 }
 0x33a   : > { %2368 = vrcp.f32 %v599_v44  ;;  %vm605_vm13 = vweird.f32 %v596_v35  ;;  %v609_v12 = vand.u32 2147483647, %v596_v35  ;;  %v627_v14 = vor.u32 1.1754944e-38, %v626_v7 }
 0x33b   : > { %v634_v39 = vadd.f32 %v2357_v27, %v633_v36  ;;  %vm625_vm15 = vcmp.eq.f32.partialorder %v624_v63, 8.507059e+37  ;;  %v612_v20 = vor.u32 1.1754944e-38, %v611_v10  ;;  %vm650_vm6 = vweird.f32 %v599_v44 }
 0x33c   : > { %vm610_vm0 = vcmp.eq.f32.partialorder %v609_v12, 8.507059e+37  ;;  %v654_v29 = vand.u32 2147483647, %v599_v44 }
 0x33d   : > { %v638_v45 = vsel %vm637_vm7, %v2357_v27, %v634_v39  ;;  %v656_v27 = vand.u32 2147483648, %v599_v44  ;;  %v670_v39 = vrot.slane %v2941_v42, 7 }
 0x33e   : > { %v2365_v43 = vpop.eup %2364  ;;  %v2985_v52 = vsel %vm640_vm8, %v642_v48, %v638_v45  ;;  %vm655_vm8 = vcmp.eq.f32.partialorder %v654_v29, 8.507059e+37 }
 0x33f   : > { %v2367_v47 = vpop.eup %2366  ;;  %v616_v49 = vmul.f32 %v2365_v43, %v597_v34  ;;  %vm621_vm9 = vweird.f32 %v2365_v43  ;;  %v657_v31 = vor.u32 1.1754944e-38, %v656_v27  ;;  %v678_v41 = vmul.f32 %v670_v39, %v2985_v52 }
 0x340   : > { %v601_v56 = vmul.f32 %v2367_v47, %v596_v35  ;;  %v2369_v61 = vpop.eup %2368  ;;  %vm606_vm11 = vweird.f32 %v2367_v47  ;;  %vm622_vm12 = vmor %vm620_vm10, %vm621_vm9  ;;  %v668_v35 = vrot.slane %v2947_v46, 7 }
 0x341   : > { %v617_v58 = vsub.f32 1.0, %v616_v49  ;;  %v646_v2 = vmul.f32 %v2369_v61, %v599_v44  ;;  %vm607_vm14 = vmor %vm605_vm13, %vm606_vm11  ;;  %vm651_vm5 = vweird.f32 %v2369_v61  ;;  %v671_v44 = vrot.slane %v2951_v50, 7 }
 0x342   : > { %v602_v59 = vsub.f32 1.0, %v601_v56  ;;  %vm652_vm7 = vmor %vm650_vm6, %vm651_vm5  ;;  %v669_v50 = vrot.slane %v2938_v38, 7 }
 0x343   : > { %v618_v62 = vmul.f32 %v2365_v43, %v617_v58  ;;  %v647_v9 = vsub.f32 1.0, %v646_v2 }
 0x344   : > { %v603_v0 = vmul.f32 %v2367_v47, %v602_v59 }
 0x345   : > { %v619_v4 = vadd.f32 %v2365_v43, %v618_v62  ;;  %v648_v16 = vmul.f32 %v2369_v61, %v647_v9 }
 0x346   : > { %v604_v8 = vadd.f32 %v2367_v47, %v603_v0 }
 0x347   : > { %v623_v11 = vsel %vm622_vm12, %v2365_v43, %v619_v4  ;;  %v649_v26 = vadd.f32 %v2369_v61, %v648_v16 }
 0x348   : > { %v608_v15 = vsel %vm607_vm14, %v2367_v47, %v604_v8  ;;  %v628_v19 = vsel %vm625_vm15, %v627_v14, %v623_v11 }
 0x349   : > { %v613_v24 = vsel %vm610_vm0, %v612_v20, %v608_v15  ;;  %v653_v30 = vsel %vm652_vm7, %v2369_v61, %v649_v26 }
 0x34a   : > { %v658_v32 = vsel %vm655_vm8, %v657_v31, %v653_v30  ;;  %v676_v36 = vmul.f32 %v668_v35, %v613_v24 }
 0x34b   : > { %v679_v47 = vmul.f32 %v671_v44, %v658_v32 }
 0x384   : > { %v689_v51 = vpop.permute.xlu2 %688 }
 0x385   : > { %v698_v53 = vmul.f32 %v689_v51, %v2985_v52 }
 0x387   : > { %708 = vrot.lane.b32.xlu0 %v698_v53, %s2711_s13  ;;  %v677_v53 = vmul.f32 %v669_v50, %v628_v19 }
 0x399   : > { %v687_v17 = vpop.permute.xlu0 %686 }
 0x39a   : > { %v697_v21 = vmul.f32 %v687_v17, %v628_v19 }
 0x39b   : > { %v685_v22 = vpop.permute.xlu1 %684 }
 0x39c   : > { %v696_v25 = vmul.f32 %v685_v22, %v613_v24  ;;  %706 = vrot.lane.b32.xlu1 %v697_v21, %s2711_s13 }
 0x39e   : > { %704 = vrot.lane.b32.xlu2 %v696_v25, %s2711_s13 }
 0x3a3   : > { %v691_v33 = vpop.permute.xlu1 %690 }
 0x3a4   : > { %v699_v34 = vmul.f32 %v691_v33, %v658_v32 }
 0x3a6   : > { %710 = vrot.lane.b32.xlu2 %v699_v34, %s2711_s13 }
 0x3f8   : > { %v705_v37 = vpop.permute.xlu2 %704 }
 0x3f9   : > { %v2994_v40 = vadd.f32 %v705_v37, %v676_v36  ;;  %v709_v43 = vpop.permute.xlu0 %708 }
 0x3fa   : > { %v2999_v45 = vadd.f32 %v709_v43, %v678_v41 }
 0x3fb   : > { %2370 = vtanh.f32 %v2994_v40 }
 0x3fc   : > { %2372 = vtanh.f32 %v2999_v45 }
 0x400   : > { %v711_v48 = vpop.permute.xlu2 %710 }
 0x401   : > { %v2371_v46 = vpop.eup %2370  ;;  %v3002_v49 = vadd.f32 %v711_v48, %v679_v47 }
 0x402   : > { %728 = vrot.lane.b32.xlu0 %v2371_v46, %s2710_s9  ;;  %v2373_v42 = vpop.eup %2372 }
 0x403   : > { %2374 = vtanh.f32 %v3002_v49  ;;  %732 = vrot.lane.b32.xlu1 %v2373_v42, %s2710_s9 }
 0x409   : > { %v2375_v51 = vpop.eup %2374 }
 0x40a   : > { %734 = vrot.lane.b32.xlu0 %v2375_v51, %s2710_s9 }
 0x40e   : > { %v707_v56 = vpop.permute.xlu1 %706 }
 0x40f   : > { %v3009_v58 = vadd.f32 %v707_v56, %v677_v53 }
 0x411   : > { %2376 = vtanh.f32 %v3009_v58 }
 0x417   : > { %v2377_v59 = vpop.eup %2376 }
 0x418   : > { %730 = vrot.lane.b32.xlu2 %v2377_v59, %s2710_s9 }
 0x472   : > { %v731_v0 = vpop.permute.xlu2 %730 }
 0x473   : > { %v3019_v38 = vmul.f32 %v731_v0, %v628_v19 }
 0x474   : > { %v729_v61 = vpop.permute.xlu0 %728 }
 0x475   : > { %v3013_v62 = vmul.f32 %v729_v61, %v613_v24  ;;  %v733_v2 = vpop.permute.xlu1 %732 }
 0x476   : > { %v3016_v4 = vmul.f32 %v733_v2, %v2985_v52 }
 0x477   : > { %v748_v7 = vrot.slane %v3013_v62, 1 }
 0x478   : > { %v750_v63 = vrot.slane %v3016_v4, 7 }
 0x479   : > { %v749_v10 = vsel %vm540_vm1, %v3019_v38, %v748_v7 }
 0x47a   : > { %v751_v12 = vsel %vm543_vm2, %v750_v63, %v749_v10 }
 0x47c   : > { %v735_v8 = vpop.permute.xlu0 %734 }
 0x47d   : > { %v3022_v9 = vmul.f32 %v735_v8, %v658_v32 }
 0x47f   : > { %v752_v11 = vrot.slane %v3022_v9, 6 }
 0x481   : > { %v753_v14 = vsel %vm546_vm3, %v752_v11, %v751_v12 }
 0x482   : > { %754 = vrot.lane.b32.xlu1 %v753_v14, %s2711_s13 }
 0x4f4   : > { %v755_v52 = vpop.permute.xlu1 %754 }
 0x4f5   : > { %2207 = vmatmul.msk.f32.vlgmr.msrb.gmra.mxu1 %vm351_vm4, %v755_v52 }
 0x4f6   : > { %1598 = vmatpush.msrb.mxu1 %v2867_v1 }
 0x4f8   : > { %1599 = vmatpush.msrb.mxu1 %v2873_v3 }
 0x4fa   : > { %1600 = vmatpush.msrb.mxu1 %v2879_v5 }
 0x4fc   : > { %1601 = vmatpush.msrb.mxu1 %v2887_v6 }
 0x572   : > { %v775_v15 = vpop.f32.mrf.mxu1 }
 0x573   : > { %v779_v16 = vrot.slane %v775_v15, 6  ;;  %v780_v17 = vrot.slane %v775_v15, 7  ;;  %v781_v19 = vrot.slane %v775_v15, 1  ;;  %v788_v24 = vadd.f32 %v775_v15, %v2922_v23 }
 0x575   : > { %v786_v20 = vadd.f32 %v779_v16, %v2915_v13  ;;  %v787_v21 = vadd.f32 %v780_v17, %v2918_v18  ;;  %v789_v22 = vadd.f32 %v781_v19, %v2926_v28  ;;  %v2210_v26 = vmul.f32 -1.442695, %v788_v24 }
 0x577   : > { %2378 = vtanh.f32 %v786_v20  ;;  %v2208_v25 = vmul.f32 -1.442695, %v786_v20  ;;  %v2209_v34 = vmul.f32 -1.442695, %v787_v21  ;;  %v2211_v35 = vmul.f32 -1.442695, %v789_v22 }
 0x578   : > { %2380 = vtanh.f32 %v787_v21 }
 0x579   : > { %2382 = vtanh.f32 %v789_v22 }
 0x57a   : > { %2384 = vtanh.f32 %v788_v24 }
 0x57b   : > { %2386 = vpow2.f32 %v2208_v25 }
 0x57c   : > { %2388 = vpow2.f32 %v2210_v26 }
 0x57d   : > { %v2379_v1 = vpop.eup %2378 }
 0x57e   : > { %890 = vrot.lane.b32.xlu2 %v2379_v1, %s2710_s9  ;;  %v2381_v3 = vpop.eup %2380 }
 0x57f   : > { %v2383_v5 = vpop.eup %2382  ;;  %892 = vrot.lane.b32.xlu0 %v2381_v3, %s2710_s9 }
 0x580   : > { %896 = vrot.lane.b32.xlu1 %v2383_v5, %s2710_s9  ;;  %v2385_v6 = vpop.eup %2384 }
 0x581   : > { %v2387_v27 = vpop.eup %2386 }
 0x582   : > { %v802_v29 = vadd.f32 1.0, %v2387_v27  ;;  %v2389_v30 = vpop.eup %2388 }
 0x583   : > { %v804_v31 = vadd.f32 1.0, %v2389_v30 }
 0x584   : > { %2390 = vrcp.f32 %v802_v29  ;;  %v817_v46 = vand.u32 2147483648, %v802_v29  ;;  %vm811_vm10 = vweird.f32 %v802_v29  ;;  %v815_v42 = vand.u32 2147483647, %v802_v29 }
 0x585   : > { %2392 = vrcp.f32 %v804_v31  ;;  %v847_v63 = vand.u32 2147483648, %v804_v31  ;;  %vm841_vm14 = vweird.f32 %v804_v31  ;;  %v845_v8 = vand.u32 2147483647, %v804_v31 }
 0x586   : > { %894 = vrot.lane.b32.xlu2 %v2385_v6, %s2710_s9  ;;  %2394 = vpow2.f32 %v2209_v34  ;;  %v818_v59 = vor.u32 1.1754944e-38, %v817_v46  ;;  %vm816_vm12 = vcmp.eq.f32.partialorder %v815_v42, 8.507059e+37  ;;  %v876_v46 = vrot.slane %v2999_v45, 7 }
 0x587   : > { %2396 = vpow2.f32 %v2211_v35  ;;  %v848_v12 = vor.u32 1.1754944e-38, %v847_v63  ;;  %vm846_vm0 = vcmp.eq.f32.partialorder %v845_v8, 8.507059e+37  ;;  %v875_v45 = vrot.slane %v3009_v58, 7 }
 0x58a   : > { %v2391_v32 = vpop.eup %2390 }
 0x58b   : > { %v807_v33 = vmul.f32 %v2391_v32, %v802_v29  ;;  %v2393_v37 = vpop.eup %2392  ;;  %vm812_vm9 = vweird.f32 %v2391_v32 }
 0x58c   : > { %v837_v41 = vmul.f32 %v2393_v37, %v804_v31  ;;  %v2395_v43 = vpop.eup %2394  ;;  %vm813_vm11 = vmor %vm811_vm10, %vm812_vm9  ;;  %vm842_vm13 = vweird.f32 %v2393_v37 }
 0x58d   : > { %v808_v36 = vsub.f32 1.0, %v807_v33  ;;  %v2397_v48 = vpop.eup %2396  ;;  %v803_v51 = vadd.f32 1.0, %v2395_v43  ;;  %vm843_vm15 = vmor %vm841_vm14, %vm842_vm13  ;;  %vm1992_vm13 = vcmask 1041408   ;;  %vm1987_vm14 = vcmask 1040384  }
 0x58e   : > { %v838_v47 = vsub.f32 1.0, %v837_v41  ;;  %v805_v50 = vadd.f32 1.0, %v2397_v48 }
 0x58f   : > { %v809_v39 = vmul.f32 %v2391_v32, %v808_v36  ;;  %2398 = vrcp.f32 %v803_v51  ;;  %v832_v5 = vand.u32 2147483648, %v803_v51  ;;  %vm826_vm7 = vweird.f32 %v803_v51 }
 0x590   : > { %v839_v56 = vmul.f32 %v2393_v37, %v838_v47  ;;  %2400 = vrcp.f32 %v805_v50  ;;  %v862_v6 = vand.u32 2147483648, %v805_v50  ;;  %v830_v25 = vand.u32 2147483647, %v803_v51 }
 0x591   : > { %v810_v44 = vadd.f32 %v2391_v32, %v809_v39  ;;  %vm856_vm8 = vweird.f32 %v805_v50  ;;  %v860_v26 = vand.u32 2147483647, %v805_v50  ;;  %v833_v30 = vor.u32 1.1754944e-38, %v832_v5 }
 0x592   : > { %v840_v7 = vadd.f32 %v2393_v37, %v839_v56  ;;  %v863_v31 = vor.u32 1.1754944e-38, %v862_v6  ;;  %v874_v39 = vrot.slane %v2994_v40, 7  ;;  %v877_v47 = vrot.slane %v3002_v49, 7 }
 0x593   : > { %v814_v53 = vsel %vm813_vm11, %v2391_v32, %v810_v44  ;;  %vm831_vm11 = vcmp.eq.f32.partialorder %v830_v25, 8.507059e+37 }
 0x594   : > { %v3043_v0 = vsel %vm816_vm12, %v818_v59, %v814_v53  ;;  %v844_v10 = vsel %vm843_vm15, %v2393_v37, %v840_v7  ;;  %vm861_vm12 = vcmp.eq.f32.partialorder %v860_v26, 8.507059e+37 }
 0x595   : > { %v2399_v11 = vpop.eup %2398  ;;  %v3047_v52 = vsel %vm846_vm0, %v848_v12, %v844_v10  ;;  %v882_v41 = vmul.f32 %v874_v39, %v3043_v0 }
 0x596   : > { %v2401_v14 = vpop.eup %2400  ;;  %v822_v17 = vmul.f32 %v2399_v11, %v803_v51  ;;  %vm827_vm5 = vweird.f32 %v2399_v11 }
 0x597   : > { %v852_v19 = vmul.f32 %v2401_v14, %v805_v50  ;;  %vm857_vm6 = vweird.f32 %v2401_v14  ;;  %vm828_vm9 = vmor %vm826_vm7, %vm827_vm5  ;;  %v884_v50 = vmul.f32 %v876_v46, %v3047_v52 }
 0x598   : > { %v823_v20 = vsub.f32 1.0, %v822_v17  ;;  %vm858_vm10 = vmor %vm856_vm8, %vm857_vm6 }
 0x599   : > { %v853_v21 = vsub.f32 1.0, %v852_v19 }
 0x59a   : > { %v824_v22 = vmul.f32 %v2399_v11, %v823_v20 }
 0x59b   : > { %v854_v24 = vmul.f32 %v2401_v14, %v853_v21 }
 0x59c   : > { %v825_v1 = vadd.f32 %v2399_v11, %v824_v22 }
 0x59d   : > { %v855_v3 = vadd.f32 %v2401_v14, %v854_v24 }
 0x59e   : > { %v829_v27 = vsel %vm828_vm9, %v2399_v11, %v825_v1  ;;  %v1988_v11 = vsel %vm1987_vm14, %v2963_v60, %v3013_v62 }
 0x59f   : > { %v859_v29 = vsel %vm858_vm10, %v2401_v14, %v855_v3  ;;  %v834_v33 = vsel %vm831_vm11, %v833_v30, %v829_v27 }
 0x5a0   : > { %v864_v35 = vsel %vm861_vm12, %v863_v31, %v859_v29 }
 0x5a1   : > { %v885_v48 = vmul.f32 %v877_v47, %v864_v35 }
 0x5d8   : > { %v891_v61 = vpop.permute.xlu2 %890 }
 0x5d9   : > { %v902_v2 = vmul.f32 %v891_v61, %v3043_v0  ;;  %v883_v61 = vmul.f32 %v875_v45, %v834_v33 }
 0x5db   : > { %910 = vrot.lane.b32.xlu0 %v902_v2, %s2711_s13 }
 0x5e0   : > { %v895_v15 = vpop.permute.xlu2 %894 }
 0x5e1   : > { %v904_v16 = vmul.f32 %v895_v15, %v3047_v52 }
 0x5e3   : > { %914 = vrot.lane.b32.xlu0 %v904_v16, %s2711_s13  ;;  %v1989_v16 = vsel %vm1987_vm14, %v2955_v54, %v3019_v38  ;;  %v1990_v54 = vsel %vm1987_vm14, %v2957_v55, %v3016_v4 }
 0x5f1   : > { %v893_v32 = vpop.permute.xlu0 %892 }
 0x5f2   : > { %v897_v34 = vpop.permute.xlu1 %896  ;;  %v903_v36 = vmul.f32 %v893_v32, %v834_v33 }
 0x5f3   : > { %v905_v37 = vmul.f32 %v897_v34, %v864_v35 }
 0x5f4   : > { %912 = vrot.lane.b32.xlu1 %v903_v36, %s2711_s13 }
 0x5f5   : > { %916 = vrot.lane.b32.xlu2 %v905_v37, %s2711_s13 }
 0x64d   : > { %v911_v43 = vpop.permute.xlu0 %910 }
 0x64e   : > { %v3055_v44 = vadd.f32 %v911_v43, %v882_v41 }
 0x64f   : > { %v917_v42 = vpop.permute.xlu2 %916 }
 0x650   : > { %2402 = vtanh.f32 %v3055_v44  ;;  %v3060_v51 = vadd.f32 %v917_v42, %v885_v48 }
 0x652   : > { %2404 = vtanh.f32 %v3060_v51 }
 0x655   : > { %v915_v40 = vpop.permute.xlu0 %914 }
 0x656   : > { %v2403_v53 = vpop.eup %2402  ;;  %v3064_v56 = vadd.f32 %v915_v40, %v884_v50 }
 0x657   : > { %934 = vrot.lane.b32.xlu1 %v2403_v53, %s2710_s9 }
 0x658   : > { %2406 = vtanh.f32 %v3064_v56  ;;  %v2405_v49 = vpop.eup %2404 }
 0x659   : > { %940 = vrot.lane.b32.xlu0 %v2405_v49, %s2710_s9 }
 0x65e   : > { %v2407_v59 = vpop.eup %2406 }
 0x65f   : > { %938 = vrot.lane.b32.xlu1 %v2407_v59, %s2710_s9 }
 0x666   : > { %v913_v2 = vpop.permute.xlu1 %912 }
 0x667   : > { %v3071_v7 = vadd.f32 %v913_v2, %v883_v61 }
 0x669   : > { %2408 = vtanh.f32 %v3071_v7 }
 0x66f   : > { %v2409_v63 = vpop.eup %2408 }
 0x670   : > { %936 = vrot.lane.b32.xlu2 %v2409_v63, %s2710_s9 }
 0x6c9   : > { %v935_v8 = vpop.permute.xlu1 %934 }
 0x6ca   : > { %v946_v10 = vmul.f32 %v935_v8, %v3043_v0  ;;  %v937_v12 = vpop.permute.xlu2 %936  ;;  %v1991_v0 = vsel %vm1987_vm14, %v2959_v57, %v3022_v9 }
 0x6cb   : > { %v947_v14 = vmul.f32 %v937_v12, %v834_v33  ;;  %v941_v15 = vpop.permute.xlu0 %940 }
 0x6cc   : > { %v3080_v58 = vsel %vm1992_vm13, %v1988_v11, %v946_v10  ;;  %v949_v17 = vmul.f32 %v941_v15, %v864_v35  ;;  %v954_v19 = vrot.slane %v946_v10, 2 }
 0x6cd   : > { %v955_v20 = vrot.slane %v947_v14, 1  ;;  %v3089_v21 = vsel %vm1992_vm13, %v1989_v16, %v947_v14 }
 0x6ce   : > { %v3092_v60 = vsel %vm1992_vm13, %v1991_v0, %v949_v17  ;;  %v958_v38 = vrot.slane %v949_v17, 7 }
 0x6cf   : > { %v956_v24 = vsel %vm540_vm1, %v955_v20, %v954_v19 }
 0x6d1   : > { %v939_v62 = vpop.permute.xlu1 %938 }
 0x6d2   : > { %v948_v22 = vmul.f32 %v939_v62, %v3047_v52 }
 0x6d4   : > { %v3100_v1 = vsel %vm1992_vm13, %v1990_v54, %v948_v22  ;;  %v957_v57 = vsel %vm543_vm2, %v948_v22, %v956_v24 }
 0x6d5   : > { %v959_v9 = vsel %vm546_vm3, %v958_v38, %v957_v57 }
 0x6d6   : > { %960 = vrot.lane.b32.xlu2 %v959_v9, %s2711_s13 }
 0x730   : > { %v961_v3 = vpop.permute.xlu2 %960 }
 0x731   : > { %2212 = vmatmul.msk.f32.vlgmr.msra.gmra.mxu1 %vm351_vm4, %v961_v3 }
 0x7ae   : > { %v981_v52 = vpop.f32.mrf.mxu1 }
 0x7af   : > { %v985_v5 = vrot.slane %v981_v52, 5  ;;  %v986_v6 = vrot.slane %v981_v52, 6  ;;  %v987_v25 = vrot.slane %v981_v52, 7  ;;  %v995_v27 = vadd.f32 %v981_v52, %v2926_v28 }
 0x7b1   : > { %v992_v55 = vadd.f32 %v985_v5, %v2915_v13  ;;  %v993_v4 = vadd.f32 %v986_v6, %v2918_v18  ;;  %v994_v26 = vadd.f32 %v987_v25, %v2922_v23  ;;  %v2216_v43 = vmul.f32 -1.442695, %v995_v27 }
 0x7b3   : > { %2410 = vtanh.f32 %v992_v55  ;;  %v2215_v33 = vmul.f32 -1.442695, %v994_v26  ;;  %v2213_v36 = vmul.f32 -1.442695, %v992_v55  ;;  %v2214_v39 = vmul.f32 -1.442695, %v993_v4 }
 0x7b4   : > { %2412 = vtanh.f32 %v993_v4 }
 0x7b5   : > { %2414 = vtanh.f32 %v994_v26 }
 0x7b6   : > { %2416 = vtanh.f32 %v995_v27 }
 0x7b7   : > { %2418 = vpow2.f32 %v2215_v33 }
 0x7b9   : > { %v2411_v29 = vpop.eup %2410 }
 0x7ba   : > { %1096 = vrot.lane.b32.xlu0 %v2411_v29, %s2710_s9  ;;  %v2413_v30 = vpop.eup %2412 }
 0x7bb   : > { %v2415_v31 = vpop.eup %2414  ;;  %1098 = vrot.lane.b32.xlu1 %v2413_v30, %s2710_s9 }
 0x7bc   : > { %1100 = vrot.lane.b32.xlu2 %v2415_v31, %s2710_s9  ;;  %v2417_v32 = vpop.eup %2416 }
 0x7bd   : > { %v2419_v34 = vpop.eup %2418 }
 0x7be   : > { %v1010_v35 = vadd.f32 1.0, %v2419_v34 }
 0x7c0   : > { %2420 = vrcp.f32 %v1010_v35  ;;  %v1053_v59 = vand.u32 2147483648, %v1010_v35  ;;  %vm1047_vm0 = vweird.f32 %v1010_v35  ;;  %v1051_v61 = vand.u32 2147483647, %v1010_v35 }
 0x7c1   : > { %2422 = vpow2.f32 %v2213_v36 }
 0x7c2   : > { %1102 = vrot.lane.b32.xlu0 %v2417_v32, %s2710_s9  ;;  %2424 = vpow2.f32 %v2214_v39  ;;  %v1054_v8 = vor.u32 1.1754944e-38, %v1053_v59  ;;  %vm1052_vm6 = vcmp.eq.f32.partialorder %v1051_v61, 8.507059e+37 }
 0x7c3   : > { %2426 = vpow2.f32 %v2216_v43 }
 0x7c6   : > { %v2421_v37 = vpop.eup %2420 }
 0x7c7   : > { %v1043_v41 = vmul.f32 %v2421_v37, %v1010_v35  ;;  %v2423_v47 = vpop.eup %2422  ;;  %vm1048_vm15 = vweird.f32 %v2421_v37 }
 0x7c8   : > { %v1008_v46 = vadd.f32 1.0, %v2423_v47  ;;  %v2425_v42 = vpop.eup %2424  ;;  %vm1049_vm5 = vmor %vm1047_vm0, %vm1048_vm15  ;;  %v1081_v47 = vrot.slane %v3071_v7, 7 }
 0x7c9   : > { %v1044_v48 = vsub.f32 1.0, %v1043_v41  ;;  %v1009_v40 = vadd.f32 1.0, %v2425_v42  ;;  %v2427_v53 = vpop.eup %2426 }
 0x7ca   : > { %2428 = vrcp.f32 %v1008_v46  ;;  %v1011_v45 = vadd.f32 1.0, %v2427_v53  ;;  %v1023_v24 = vand.u32 2147483648, %v1008_v46  ;;  %vm1017_vm8 = vweird.f32 %v1008_v46 }
 0x7cb   : > { %v1045_v50 = vmul.f32 %v2421_v37, %v1044_v48  ;;  %2430 = vrcp.f32 %v1009_v40  ;;  %v1021_v57 = vand.u32 2147483647, %v1008_v46  ;;  %v1038_v5 = vand.u32 2147483648, %v1009_v40 }
 0x7cc   : > { %2432 = vrcp.f32 %v1011_v45  ;;  %v1024_v6 = vor.u32 1.1754944e-38, %v1023_v24  ;;  %vm1032_vm11 = vweird.f32 %v1009_v40  ;;  %v1036_v25 = vand.u32 2147483647, %v1009_v40 }
 0x7cd   : > { %v1046_v49 = vadd.f32 %v2421_v37, %v1045_v50  ;;  %vm1022_vm12 = vcmp.eq.f32.partialorder %v1021_v57, 8.507059e+37  ;;  %v1039_v30 = vor.u32 1.1754944e-38, %v1038_v5  ;;  %v1068_v31 = vand.u32 2147483648, %v1011_v45  ;;  %v2571_v5 = vld [vmem:[%s3448_s2 + $0x10] sm:$0xff] }
 0x7ce   : > { %vm1037_vm15 = vcmp.eq.f32.partialorder %v1036_v25, 8.507059e+37  ;;  %vm1062_vm0 = vweird.f32 %v1011_v45  ;;  %v1066_v32 = vand.u32 2147483647, %v1011_v45  ;;  %v1082_v48 = vrot.slane %v3064_v56, 7 }
 0x7cf   : > { %v1050_v63 = vsel %vm1049_vm5, %v2421_v37, %v1046_v49  ;;  %v1069_v37 = vor.u32 1.1754944e-38, %v1068_v31  ;;  %v1080_v56 = vrot.slane %v3055_v44, 7 }
 0x7d0   : > { %v2429_v2 = vpop.eup %2428  ;;  %v3114_v11 = vsel %vm1052_vm6, %v1054_v8, %v1050_v63  ;;  %vm1067_vm6 = vcmp.eq.f32.partialorder %v1066_v32, 8.507059e+37  ;;  %v1083_v63 = vrot.slane %v3060_v51, 7 }
 0x7d1   : > { %v1013_v12 = vmul.f32 %v2429_v2, %v1008_v46  ;;  %v2431_v14 = vpop.eup %2430  ;;  %vm1018_vm7 = vweird.f32 %v2429_v2  ;;  %v1090_v50 = vmul.f32 %v1082_v48, %v3114_v11 }
 0x7d2   : > { %v1028_v16 = vmul.f32 %v2431_v14, %v1009_v40  ;;  %v2433_v19 = vpop.eup %2432  ;;  %vm1019_vm9 = vmor %vm1017_vm8, %vm1018_vm7  ;;  %vm1033_vm10 = vweird.f32 %v2431_v14  ;;  %vm1997_vm7 = vcmask 1042432  }
 0x7d3   : > { %v1014_v17 = vsub.f32 1.0, %v1013_v12  ;;  %v1058_v62 = vmul.f32 %v2433_v19, %v1011_v45  ;;  %vm1034_vm13 = vmor %vm1032_vm11, %vm1033_vm10  ;;  %vm1063_vm14 = vweird.f32 %v2433_v19 }
 0x7d4   : > { %v1029_v0 = vsub.f32 1.0, %v1028_v16  ;;  %vm1064_vm5 = vmor %vm1062_vm0, %vm1063_vm14 }
 0x7d5   : > { %v1015_v20 = vmul.f32 %v2429_v2, %v1014_v17  ;;  %v1059_v38 = vsub.f32 1.0, %v1058_v62 }
 0x7d6   : > { %v1030_v22 = vmul.f32 %v2431_v14, %v1029_v0 }
 0x7d7   : > { %v1016_v54 = vadd.f32 %v2429_v2, %v1015_v20  ;;  %v1060_v52 = vmul.f32 %v2433_v19, %v1059_v38 }
 0x7d8   : > { %v1031_v9 = vadd.f32 %v2431_v14, %v1030_v22 }
 0x7d9   : > { %v1020_v3 = vsel %vm1019_vm9, %v2429_v2, %v1016_v54  ;;  %v1061_v29 = vadd.f32 %v2433_v19, %v1060_v52 }
 0x7da   : > { %v1025_v4 = vsel %vm1022_vm12, %v1024_v6, %v1020_v3  ;;  %v1035_v26 = vsel %vm1034_vm13, %v2431_v14, %v1031_v9  ;;  %v2573_v6 = vld [vmem:[%s3448_s2] sm:$0xff] }
 0x7db   : > { %v1040_v34 = vsel %vm1037_vm15, %v1039_v30, %v1035_v26  ;;  %v1065_v36 = vsel %vm1064_vm5, %v2433_v19, %v1061_v29  ;;  %v1088_v7 = vmul.f32 %v1080_v56, %v1025_v4 }
 0x7dc   : > { %v1070_v39 = vsel %vm1067_vm6, %v1069_v37, %v1065_v36  ;;  %v1089_v46 = vmul.f32 %v1081_v47, %v1040_v34 }
 0x7dd   : > { %v1091_v8 = vmul.f32 %v1083_v63, %v1070_v39 }
 0x816   : > { %v1101_v10 = vpop.permute.xlu2 %1100 }
 0x817   : > { %v1110_v15 = vmul.f32 %v1101_v10, %v3114_v11 }
 0x819   : > { %1120 = vrot.lane.b32.xlu0 %v1110_v15, %s2711_s13 }
 0x82c   : > { %v1097_v55 = vpop.permute.xlu0 %1096 }
 0x82d   : > { %v1108_v27 = vmul.f32 %v1097_v55, %v1025_v4  ;;  %v1099_v33 = vpop.permute.xlu1 %1098 }
 0x82e   : > { %v1109_v35 = vmul.f32 %v1099_v33, %v1040_v34 }
 0x82f   : > { %1116 = vrot.lane.b32.xlu1 %v1108_v27, %s2711_s13 }
 0x830   : > { %1118 = vrot.lane.b32.xlu2 %v1109_v35, %s2711_s13 }
 0x834   : > { %v1103_v41 = vpop.permute.xlu0 %1102 }
 0x835   : > { %v1111_v43 = vmul.f32 %v1103_v41, %v1070_v39 }
 0x837   : > { %1122 = vrot.lane.b32.xlu1 %v1111_v43, %s2711_s13 }
 0x88a   : > { %v1119_v42 = vpop.permute.xlu2 %1118 }
 0x88b   : > { %v3124_v40 = vadd.f32 %v1119_v42, %v1089_v46  ;;  %v1121_v53 = vpop.permute.xlu0 %1120 }
 0x88c   : > { %v3126_v49 = vadd.f32 %v1121_v53, %v1090_v50 }
 0x88d   : > { %2434 = vtanh.f32 %v3124_v40 }
 0x88e   : > { %2436 = vtanh.f32 %v3126_v49 }
 0x893   : > { %v2435_v59 = vpop.eup %2434 }
 0x894   : > { %v2437_v45 = vpop.eup %2436  ;;  %1142 = vrot.lane.b32.xlu0 %v2435_v59, %s2710_s9 }
 0x895   : > { %1144 = vrot.lane.b32.xlu1 %v2437_v45, %s2710_s9 }
 0x8a1   : > { %v1117_v61 = vpop.permute.xlu1 %1116 }
 0x8a2   : > { %v3133_v2 = vadd.f32 %v1117_v61, %v1088_v7 }
 0x8a4   : > { %2438 = vtanh.f32 %v3133_v2 }
 0x8a9   : > { %v1123_v10 = vpop.permute.xlu1 %1122 }
 0x8aa   : > { %v2439_v12 = vpop.eup %2438  ;;  %v3137_v14 = vadd.f32 %v1123_v10, %v1091_v8 }
 0x8ab   : > { %1140 = vrot.lane.b32.xlu2 %v2439_v12, %s2710_s9 }
 0x8ac   : > { %2440 = vtanh.f32 %v3137_v14 }
 0x8b2   : > { %v2441_v15 = vpop.eup %2440 }
 0x8b3   : > { %1146 = vrot.lane.b32.xlu2 %v2441_v15, %s2710_s9 }
 0x905   : > { %v1141_v44 = vpop.permute.xlu2 %1140 }
 0x906   : > { %v1152_v16 = vmul.f32 %v1141_v44, %v1025_v4  ;;  %v1143_v51 = vpop.permute.xlu0 %1142 }
 0x907   : > { %v1153_v19 = vmul.f32 %v1143_v51, %v1040_v34  ;;  %v1145_v0 = vpop.permute.xlu1 %1144 }
 0x908   : > { %v3144_v17 = vsel %vm1997_vm7, %v3080_v58, %v1152_v16  ;;  %v1160_v20 = vrot.slane %v1152_v16, 3  ;;  %v1154_v62 = vmul.f32 %v1145_v0, %v3114_v11 }
 0x909   : > { %v1161_v22 = vrot.slane %v1153_v19, 2  ;;  %v3149_v54 = vsel %vm1997_vm7, %v3089_v21, %v1153_v19 }
 0x90a   : > { %v1163_v38 = vrot.slane %v1154_v62, 1  ;;  %v3153_v24 = vsel %vm1997_vm7, %v3100_v1, %v1154_v62  ;;  %v2570_v1 = vld [vmem:[%s3448_s2 + $0x18] sm:$0xff] }
 0x90b   : > { %v1162_v58 = vsel %vm540_vm1, %v1161_v22, %v1160_v20 }
 0x90c   : > { %v1164_v3 = vsel %vm543_vm2, %v1163_v38, %v1162_v58 }
 0x90d   : > { %v1147_v57 = vpop.permute.xlu2 %1146 }
 0x90e   : > { %v1155_v9 = vmul.f32 %v1147_v57, %v1070_v39 }
 0x910   : > { %v3159_v52 = vsel %vm1997_vm7, %v3092_v60, %v1155_v9  ;;  %v1165_v11 = vsel %vm546_vm3, %v1155_v9, %v1164_v3  ;;  %v2572_v60 = vld [vmem:[%s3448_s2 + $0x8] sm:$0xff] }
 0x911   : > { %1166 = vrot.lane.b32.xlu0 %v1165_v11, %s2711_s13 }
 0x983   : > { %v1167_v21 = vpop.permute.xlu0 %1166 }
 0x984   : > { %2217 = vmatmul.msk.f32.vlgmr.msrb.gmra.mxu2 %vm351_vm4, %v1167_v21 }
 0x985   : > { %1806 = vmatpush.msrb.mxu2 %v2570_v1 }
 0x987   : > { %1807 = vmatpush.msrb.mxu2 %v2571_v5 }
 0x989   : > { %1808 = vmatpush.msrb.mxu2 %v2572_v60 }
 0x98b   : > { %1809 = vmatpush.msrb.mxu2 %v2573_v6 }
 0xa07   : > { %v1187_v25 = vpop.f32.mrf.mxu2 }
 0xa08   : > { %v1191_v55 = vrot.slane %v1187_v25, 4  ;;  %v1192_v4 = vrot.slane %v1187_v25, 5  ;;  %v1193_v26 = vrot.slane %v1187_v25, 6  ;;  %v1194_v30 = vrot.slane %v1187_v25, 7 }
 0xa0a   : > { %v1199_v27 = vadd.f32 %v1191_v55, %v2915_v13  ;;  %v1200_v29 = vadd.f32 %v1192_v4, %v2918_v18  ;;  %v1201_v31 = vadd.f32 %v1193_v26, %v2922_v23  ;;  %v1202_v32 = vadd.f32 %v1194_v30, %v2926_v28 }
 0xa0c   : > { %2442 = vtanh.f32 %v1199_v27  ;;  %v2219_v37 = vmul.f32 -1.442695, %v1200_v29  ;;  %v2218_v47 = vmul.f32 -1.442695, %v1199_v27  ;;  %v2220_v46 = vmul.f32 -1.442695, %v1201_v31 }
 0xa0d   : > { %2444 = vtanh.f32 %v1200_v29  ;;  %v2221_v50 = vmul.f32 -1.442695, %v1202_v32 }
 0xa0e   : > { %2446 = vtanh.f32 %v1201_v31 }
 0xa0f   : > { %2448 = vtanh.f32 %v1202_v32 }
 0xa10   : > { %2450 = vpow2.f32 %v2219_v37 }
 0xa12   : > { %v2443_v33 = vpop.eup %2442 }
 0xa13   : > { %v2445_v34 = vpop.eup %2444  ;;  %1303 = vrot.lane.b32.xlu1 %v2443_v33, %s2710_s9 }
 0xa14   : > { %1305 = vrot.lane.b32.xlu2 %v2445_v34, %s2710_s9  ;;  %v2447_v35 = vpop.eup %2446 }
 0xa15   : > { %1307 = vrot.lane.b32.xlu0 %v2447_v35, %s2710_s9  ;;  %v2449_v36 = vpop.eup %2448 }
 0xa16   : > { %v2451_v39 = vpop.eup %2450 }
 0xa17   : > { %v1216_v41 = vadd.f32 1.0, %v2451_v39 }
 0xa19   : > { %2452 = vrcp.f32 %v1216_v41  ;;  %v1245_v61 = vand.u32 2147483648, %v1216_v41  ;;  %vm1239_vm9 = vweird.f32 %v1216_v41  ;;  %v1243_v63 = vand.u32 2147483647, %v1216_v41 }
 0xa1a   : > { %2454 = vpow2.f32 %v2218_v47 }
 0xa1b   : > { %1309 = vrot.lane.b32.xlu1 %v2449_v36, %s2710_s9  ;;  %2456 = vpow2.f32 %v2220_v46  ;;  %v1246_v15 = vor.u32 1.1754944e-38, %v1245_v61  ;;  %vm1244_vm11 = vcmp.eq.f32.partialorder %v1243_v63, 8.507059e+37 }
 0xa1c   : > { %2458 = vpow2.f32 %v2221_v50  ;;  %v1287_v50 = vrot.slane %v3133_v2, 7 }
 0xa1f   : > { %v2453_v43 = vpop.eup %2452 }
 0xa20   : > { %v1235_v48 = vmul.f32 %v2453_v43, %v1216_v41  ;;  %v2455_v53 = vpop.eup %2454  ;;  %vm1240_vm8 = vweird.f32 %v2453_v43 }
 0xa21   : > { %v1215_v45 = vadd.f32 1.0, %v2455_v53  ;;  %v2457_v7 = vpop.eup %2456  ;;  %vm1241_vm10 = vmor %vm1239_vm9, %vm1240_vm8  ;;  %v1288_v53 = vrot.slane %v3124_v40, 7 }
 0xa22   : > { %v1236_v42 = vsub.f32 1.0, %v1235_v48  ;;  %v2459_v8 = vpop.eup %2458  ;;  %v1217_v10 = vadd.f32 1.0, %v2457_v7 }
 0xa23   : > { %2460 = vrcp.f32 %v1215_v45  ;;  %v1218_v44 = vadd.f32 1.0, %v2459_v8  ;;  %v1230_v1 = vand.u32 2147483648, %v1215_v45  ;;  %vm1224_vm13 = vweird.f32 %v1215_v45 }
 0xa24   : > { %v1237_v59 = vmul.f32 %v2453_v43, %v1236_v42  ;;  %2462 = vrcp.f32 %v1217_v10  ;;  %v1228_v60 = vand.u32 2147483647, %v1215_v45  ;;  %vm1254_vm5 = vweird.f32 %v1217_v10 }
 0xa25   : > { %2464 = vrcp.f32 %v1218_v44  ;;  %v1231_v55 = vor.u32 1.1754944e-38, %v1230_v1  ;;  %v1260_v26 = vand.u32 2147483648, %v1217_v10  ;;  %v1258_v30 = vand.u32 2147483647, %v1217_v10 }
 0xa26   : > { %v1238_v56 = vadd.f32 %v2453_v43, %v1237_v59  ;;  %vm1229_vm0 = vcmp.eq.f32.partialorder %v1228_v60, 8.507059e+37  ;;  %v1275_v33 = vand.u32 2147483648, %v1218_v44  ;;  %vm1269_vm8 = vweird.f32 %v1218_v44 }
 0xa27   : > { %v1273_v35 = vand.u32 2147483647, %v1218_v44  ;;  %v1261_v36 = vor.u32 1.1754944e-38, %v1260_v26  ;;  %v1290_v8 = vrot.slane %v3137_v14, 7 }
 0xa28   : > { %v1242_v12 = vsel %vm1241_vm10, %v2453_v43, %v1238_v56  ;;  %vm1259_vm10 = vcmp.eq.f32.partialorder %v1258_v30, 8.507059e+37  ;;  %v1276_v43 = vor.u32 1.1754944e-38, %v1275_v33 }
 0xa29   : > { %v3184_v51 = vsel %vm1244_vm11, %v1246_v15, %v1242_v12  ;;  %v2461_v19 = vpop.eup %2460  ;;  %vm1274_vm11 = vcmp.eq.f32.partialorder %v1273_v35, 8.507059e+37 }
 0xa2a   : > { %v1220_v20 = vmul.f32 %v2461_v19, %v1215_v45  ;;  %v2463_v62 = vpop.eup %2462  ;;  %vm1225_vm12 = vweird.f32 %v2461_v19  ;;  %v1296_v45 = vmul.f32 %v1288_v53, %v3184_v51 }
 0xa2b   : > { %v2465_v38 = vpop.eup %2464  ;;  %v1250_v57 = vmul.f32 %v2463_v62, %v1217_v10  ;;  %vm1226_vm14 = vmor %vm1224_vm13, %vm1225_vm12  ;;  %vm1255_vm15 = vweird.f32 %v2463_v62  ;;  %vm2002_vm12 = vcmask 1043456  }
 0xa2c   : > { %v1221_v22 = vsub.f32 1.0, %v1220_v20  ;;  %v1265_v58 = vmul.f32 %v2465_v38, %v1218_v44  ;;  %vm1270_vm6 = vweird.f32 %v2465_v38  ;;  %vm1256_vm7 = vmor %vm1254_vm5, %vm1255_vm15 }
 0xa2d   : > { %v1251_v3 = vsub.f32 1.0, %v1250_v57  ;;  %vm1271_vm9 = vmor %vm1269_vm8, %vm1270_vm6 }
 0xa2e   : > { %v1222_v9 = vmul.f32 %v2461_v19, %v1221_v22  ;;  %v1266_v21 = vsub.f32 1.0, %v1265_v58 }
 0xa2f   : > { %v1252_v5 = vmul.f32 %v2463_v62, %v1251_v3 }
 0xa30   : > { %v1223_v11 = vadd.f32 %v2461_v19, %v1222_v9  ;;  %v1267_v25 = vmul.f32 %v2465_v38, %v1266_v21 }
 0xa31   : > { %v1253_v4 = vadd.f32 %v2463_v62, %v1252_v5 }
 0xa32   : > { %v1227_v6 = vsel %vm1226_vm14, %v2461_v19, %v1223_v11  ;;  %v1268_v32 = vadd.f32 %v2465_v38, %v1267_v25 }
 0xa33   : > { %v1232_v29 = vsel %vm1229_vm0, %v1231_v55, %v1227_v6  ;;  %v1257_v34 = vsel %vm1256_vm7, %v2463_v62, %v1253_v4 }
 0xa34   : > { %v1272_v37 = vsel %vm1271_vm9, %v2465_v38, %v1268_v32  ;;  %v1262_v41 = vsel %vm1259_vm10, %v1261_v36, %v1257_v34  ;;  %v1295_v59 = vmul.f32 %v1287_v50, %v1232_v29 }
 0xa35   : > { %v1277_v48 = vsel %vm1274_vm11, %v1276_v43, %v1272_v37 }
 0xa36   : > { %v1298_v10 = vmul.f32 %v1290_v8, %v1277_v48 }
 0xa6e   : > { %v1306_v16 = vpop.permute.xlu2 %1305 }
 0xa6f   : > { %v1316_v0 = vmul.f32 %v1306_v16, %v3184_v51  ;;  %v1289_v16 = vrot.slane %v3126_v49, 7 }
 0xa71   : > { %1325 = vrot.lane.b32.xlu0 %v1316_v0, %s2711_s13  ;;  %v1297_v19 = vmul.f32 %v1289_v16, %v1262_v41 }
 0xa85   : > { %v1304_v27 = vpop.permute.xlu1 %1303 }
 0xa86   : > { %v1315_v31 = vmul.f32 %v1304_v27, %v1232_v29 }
 0xa87   : > { %v1308_v39 = vpop.permute.xlu0 %1307 }
 0xa88   : > { %1323 = vrot.lane.b32.xlu2 %v1315_v31, %s2711_s13  ;;  %v1317_v47 = vmul.f32 %v1308_v39, %v1262_v41 }
 0xa8a   : > { %1327 = vrot.lane.b32.xlu1 %v1317_v47, %s2711_s13 }
 0xa8d   : > { %v1310_v46 = vpop.permute.xlu1 %1309 }
 0xa8e   : > { %v1318_v42 = vmul.f32 %v1310_v46, %v1277_v48 }
 0xa90   : > { %1329 = vrot.lane.b32.xlu2 %v1318_v42, %s2711_s13 }
 0xae2   : > { %v1324_v56 = vpop.permute.xlu2 %1323 }
 0xae3   : > { %v1326_v7 = vpop.permute.xlu0 %1325  ;;  %v3194_v61 = vadd.f32 %v1324_v56, %v1295_v59 }
 0xae4   : > { %v3196_v63 = vadd.f32 %v1326_v7, %v1296_v45 }
 0xae5   : > { %2466 = vtanh.f32 %v3194_v61 }
 0xae6   : > { %2468 = vtanh.f32 %v3196_v63 }
 0xaea   : > { %v1330_v12 = vpop.permute.xlu2 %1329 }
 0xaeb   : > { %v2467_v2 = vpop.eup %2466  ;;  %v3201_v15 = vadd.f32 %v1330_v12, %v1298_v10 }
 0xaec   : > { %v2469_v40 = vpop.eup %2468  ;;  %1347 = vrot.lane.b32.xlu0 %v2467_v2, %s2710_s9 }
 0xaed   : > { %2470 = vtanh.f32 %v3201_v15  ;;  %1349 = vrot.lane.b32.xlu1 %v2469_v40, %s2710_s9 }
 0xaf3   : > { %v2471_v44 = vpop.eup %2470 }
 0xaf4   : > { %1353 = vrot.lane.b32.xlu0 %v2471_v44, %s2710_s9 }
 0xafc   : > { %v1328_v0 = vpop.permute.xlu1 %1327 }
 0xafd   : > { %v3208_v14 = vadd.f32 %v1328_v0, %v1297_v19 }
 0xaff   : > { %2472 = vtanh.f32 %v3208_v14 }
 0xb05   : > { %v2473_v20 = vpop.eup %2472 }
 0xb06   : > { %1351 = vrot.lane.b32.xlu2 %v2473_v20, %s2710_s9 }
 0xb5e   : > { %v1348_v62 = vpop.permute.xlu0 %1347 }
 0xb5f   : > { %v1350_v22 = vpop.permute.xlu1 %1349  ;;  %v1359_v38 = vmul.f32 %v1348_v62, %v1232_v29 }
 0xb60   : > { %v1360_v57 = vmul.f32 %v1350_v22, %v3184_v51  ;;  %v1352_v11 = vpop.permute.xlu2 %1351 }
 0xb61   : > { %v3215_v9 = vsel %vm2002_vm12, %v3144_v17, %v1359_v38  ;;  %v1367_v3 = vrot.slane %v1359_v38, 4  ;;  %v1361_v21 = vmul.f32 %v1352_v11, %v1262_v41 }
 0xb62   : > { %v3219_v49 = vsel %vm2002_vm12, %v3149_v54, %v1360_v57  ;;  %v1368_v58 = vrot.slane %v1360_v57, 3 }
 0xb63   : > { %v1370_v5 = vrot.slane %v1361_v21, 2  ;;  %v3223_v60 = vsel %vm2002_vm12, %v3153_v24, %v1361_v21 }
 0xb64   : > { %v1369_v51 = vsel %vm540_vm1, %v1368_v58, %v1367_v3 }
 0xb65   : > { %v1371_v54 = vsel %vm543_vm2, %v1370_v5, %v1369_v51 }
 0xb66   : > { %v1354_v1 = vpop.permute.xlu0 %1353 }
 0xb67   : > { %v1362_v6 = vmul.f32 %v1354_v1, %v1277_v48 }
 0xb69   : > { %v1372_v25 = vrot.slane %v1362_v6, 1  ;;  %v3228_v17 = vsel %vm2002_vm12, %v3159_v52, %v1362_v6 }
 0xb6b   : > { %v1373_v55 = vsel %vm546_vm3, %v1372_v25, %v1371_v54 }
 0xb6c   : > { %1374 = vrot.lane.b32.xlu1 %v1373_v55, %s2711_s13 }
 0xbde   : > { %v1375_v4 = vpop.permute.xlu1 %1374 }
 0xbdf   : > { %2222 = vmatmul.msk.f32.vlgmr.msra.gmra.mxu2 %vm351_vm4, %v1375_v4 }
 0xc62   : > { %v1395_v26 = vpop.f32.mrf.mxu2 }
 0xc63   : > { %v1399_v24 = vrot.slane %v1395_v26, 3  ;;  %v1400_v27 = vrot.slane %v1395_v26, 4  ;;  %v1401_v29 = vrot.slane %v1395_v26, 5  ;;  %v1402_v32 = vrot.slane %v1395_v26, 6 }
 0xc65   : > { %v1407_v30 = vadd.f32 %v1399_v24, %v2915_v13  ;;  %v1408_v31 = vadd.f32 %v1400_v27, %v2918_v18  ;;  %v1409_v52 = vadd.f32 %v1401_v29, %v2922_v23  ;;  %v1410_v33 = vadd.f32 %v1402_v32, %v2926_v28 }
 0xc67   : > { %2474 = vtanh.f32 %v1407_v30  ;;  %v2223_v39 = vmul.f32 -1.442695, %v1407_v30  ;;  %v2226_v41 = vmul.f32 -1.442695, %v1410_v33  ;;  %v2224_v50 = vmul.f32 -1.442695, %v1408_v31 }
 0xc68   : > { %2476 = vtanh.f32 %v1408_v31  ;;  %v2225_v59 = vmul.f32 -1.442695, %v1409_v52 }
 0xc69   : > { %2478 = vtanh.f32 %v1409_v52 }
 0xc6a   : > { %2480 = vtanh.f32 %v1410_v33 }
 0xc6b   : > { %2482 = vpow2.f32 %v2223_v39 }
 0xc6c   : > { %2484 = vpow2.f32 %v2226_v41 }
 0xc6d   : > { %v2475_v34 = vpop.eup %2474 }
 0xc6e   : > { %v2477_v35 = vpop.eup %2476  ;;  %1511 = vrot.lane.b32.xlu2 %v2475_v34, %s2710_s9 }
 0xc6f   : > { %1513 = vrot.lane.b32.xlu0 %v2477_v35, %s2710_s9  ;;  %v2479_v36 = vpop.eup %2478 }
 0xc70   : > { %1515 = vrot.lane.b32.xlu1 %v2479_v36, %s2710_s9  ;;  %v2481_v37 = vpop.eup %2480 }
 0xc71   : > { %v2483_v43 = vpop.eup %2482 }
 0xc72   : > { %v1423_v47 = vadd.f32 1.0, %v2483_v43  ;;  %v2485_v48 = vpop.eup %2484 }
 0xc73   : > { %v1426_v46 = vadd.f32 1.0, %v2485_v48 }
 0xc74   : > { %2486 = vrcp.f32 %v1423_v47  ;;  %v1438_v44 = vand.u32 2147483648, %v1423_v47  ;;  %vm1432_vm14 = vweird.f32 %v1423_v47  ;;  %v1436_v19 = vand.u32 2147483647, %v1423_v47 }
 0xc75   : > { %2488 = vrcp.f32 %v1426_v46  ;;  %v1483_v11 = vand.u32 2147483648, %v1426_v46  ;;  %vm1477_vm6 = vweird.f32 %v1426_v46  ;;  %v1481_v1 = vand.u32 2147483647, %v1426_v46 }
 0xc76   : > { %1517 = vrot.lane.b32.xlu2 %v2481_v37, %s2710_s9  ;;  %2490 = vpow2.f32 %v2224_v50  ;;  %v1439_v22 = vor.u32 1.1754944e-38, %v1438_v44  ;;  %vm1437_vm0 = vcmp.eq.f32.partialorder %v1436_v19, 8.507059e+37  ;;  %v1496_v19 = vrot.slane %v3196_v63, 7 }
 0xc77   : > { %2492 = vpow2.f32 %v2225_v59  ;;  %v1484_v6 = vor.u32 1.1754944e-38, %v1483_v11  ;;  %vm1482_vm8 = vcmp.eq.f32.partialorder %v1481_v1, 8.507059e+37 }
 0xc7a   : > { %v2487_v42 = vpop.eup %2486 }
 0xc7b   : > { %v1428_v53 = vmul.f32 %v2487_v42, %v1423_v47  ;;  %v2489_v56 = vpop.eup %2488  ;;  %vm1433_vm13 = vweird.f32 %v2487_v42 }
 0xc7c   : > { %v1473_v8 = vmul.f32 %v2489_v56, %v1426_v46  ;;  %v2491_v10 = vpop.eup %2490  ;;  %vm1434_vm15 = vmor %vm1432_vm14, %vm1433_vm13  ;;  %vm1478_vm5 = vweird.f32 %v2489_v56 }
 0xc7d   : > { %v1429_v45 = vsub.f32 1.0, %v1428_v53  ;;  %v1424_v12 = vadd.f32 1.0, %v2491_v10  ;;  %v2493_v16 = vpop.eup %2492  ;;  %vm1479_vm7 = vmor %vm1477_vm6, %vm1478_vm5  ;;  %v1495_v53 = vrot.slane %v3194_v61, 7  ;;  %vm2007_vm5 = vcmask 1044480  }
 0xc7e   : > { %v1474_v40 = vsub.f32 1.0, %v1473_v8  ;;  %v1425_v62 = vadd.f32 1.0, %v2493_v16  ;;  %v1498_v8 = vrot.slane %v3201_v15, 7 }
 0xc7f   : > { %v1430_v7 = vmul.f32 %v2487_v42, %v1429_v45  ;;  %2494 = vrcp.f32 %v1424_v12  ;;  %v1453_v32 = vand.u32 2147483648, %v1424_v12  ;;  %vm1447_vm10 = vweird.f32 %v1424_v12 }
 0xc80   : > { %v1475_v20 = vmul.f32 %v2489_v56, %v1474_v40  ;;  %2496 = vrcp.f32 %v1425_v62  ;;  %v1451_v52 = vand.u32 2147483647, %v1424_v12  ;;  %v1468_v36 = vand.u32 2147483648, %v1425_v62 }
 0xc81   : > { %v1431_v2 = vadd.f32 %v2487_v42, %v1430_v7  ;;  %v1454_v35 = vor.u32 1.1754944e-38, %v1453_v32  ;;  %vm1462_vm14 = vweird.f32 %v1425_v62  ;;  %v1466_v37 = vand.u32 2147483647, %v1425_v62 }
 0xc82   : > { %v1476_v3 = vadd.f32 %v2489_v56, %v1475_v20  ;;  %vm1452_vm13 = vcmp.eq.f32.partialorder %v1451_v52, 8.507059e+37  ;;  %v1469_v48 = vor.u32 1.1754944e-38, %v1468_v36  ;;  %v1497_v7 = vrot.slane %v3208_v14, 7 }
 0xc83   : > { %v1435_v0 = vsel %vm1434_vm15, %v2487_v42, %v1431_v2 }
 0xc84   : > { %v3242_v57 = vsel %vm1437_vm0, %v1439_v22, %v1435_v0  ;;  %v1480_v5 = vsel %vm1479_vm7, %v2489_v56, %v1476_v3  ;;  %vm1467_vm0 = vcmp.eq.f32.partialorder %v1466_v37, 8.507059e+37 }
 0xc85   : > { %v2495_v21 = vpop.eup %2494  ;;  %v3246_v54 = vsel %vm1482_vm8, %v1484_v6, %v1480_v5  ;;  %v1503_v59 = vmul.f32 %v1495_v53, %v3242_v57 }
 0xc86   : > { %v1443_v51 = vmul.f32 %v2495_v21, %v1424_v12  ;;  %v2497_v25 = vpop.eup %2496  ;;  %vm1448_vm9 = vweird.f32 %v2495_v21  ;;  %v1506_v40 = vmul.f32 %v1498_v8, %v3246_v54 }
 0xc87   : > { %v1458_v24 = vmul.f32 %v2497_v25, %v1425_v62  ;;  %vm1449_vm11 = vmor %vm1447_vm10, %vm1448_vm9  ;;  %vm1463_vm12 = vweird.f32 %v2497_v25 }
 0xc88   : > { %v1444_v26 = vsub.f32 1.0, %v1443_v51  ;;  %vm1464_vm15 = vmor %vm1462_vm14, %vm1463_vm12 }
 0xc89   : > { %v1459_v29 = vsub.f32 1.0, %v1458_v24 }
 0xc8a   : > { %v1445_v27 = vmul.f32 %v2495_v21, %v1444_v26 }
 0xc8b   : > { %v1460_v31 = vmul.f32 %v2497_v25, %v1459_v29 }
 0xc8c   : > { %v1446_v30 = vadd.f32 %v2495_v21, %v1445_v27 }
 0xc8d   : > { %v1461_v34 = vadd.f32 %v2497_v25, %v1460_v31 }
 0xc8e   : > { %v1450_v33 = vsel %vm1449_vm11, %v2495_v21, %v1446_v30 }
 0xc8f   : > { %v1455_v41 = vsel %vm1452_vm13, %v1454_v35, %v1450_v33  ;;  %v1465_v47 = vsel %vm1464_vm15, %v2497_v25, %v1461_v34 }
 0xc90   : > { %v1470_v42 = vsel %vm1467_vm0, %v1469_v48, %v1465_v47  ;;  %v1504_v0 = vmul.f32 %v1496_v19, %v1455_v41 }
 0xc91   : > { %v1505_v10 = vmul.f32 %v1497_v7, %v1470_v42 }
 0xcc8   : > { %v1512_v38 = vpop.permute.xlu2 %1511 }
 0xcc9   : > { %v1523_v58 = vmul.f32 %v1512_v38, %v3242_v57 }
 0xccb   : > { %1531 = vrot.lane.b32.xlu0 %v1523_v58, %s2711_s13 }
 0xcd0   : > { %v1518_v55 = vpop.permute.xlu2 %1517 }
 0xcd1   : > { %v1526_v4 = vmul.f32 %v1518_v55, %v3246_v54 }
 0xcd3   : > { %1537 = vrot.lane.b32.xlu0 %v1526_v4, %s2711_s13 }
 0xce1   : > { %v1514_v39 = vpop.permute.xlu0 %1513 }
 0xce2   : > { %v1524_v43 = vmul.f32 %v1514_v39, %v1455_v41  ;;  %v1516_v46 = vpop.permute.xlu1 %1515 }
 0xce3   : > { %v1525_v50 = vmul.f32 %v1516_v46, %v1470_v42 }
 0xce4   : > { %1533 = vrot.lane.b32.xlu1 %v1524_v43, %s2711_s13 }
 0xce5   : > { %1535 = vrot.lane.b32.xlu2 %v1525_v50, %s2711_s13 }
 0xd3d   : > { %v1532_v45 = vpop.permute.xlu0 %1531 }
 0xd3e   : > { %v3254_v56 = vadd.f32 %v1532_v45, %v1503_v59 }
 0xd3f   : > { %v1536_v12 = vpop.permute.xlu2 %1535 }
 0xd40   : > { %2498 = vtanh.f32 %v3254_v56  ;;  %v3259_v2 = vadd.f32 %v1536_v12, %v1505_v10 }
 0xd42   : > { %2500 = vtanh.f32 %v3259_v2 }
 0xd45   : > { %v1538_v44 = vpop.permute.xlu0 %1537 }
 0xd46   : > { %v2499_v16 = vpop.eup %2498  ;;  %v3263_v61 = vadd.f32 %v1538_v44, %v1506_v40 }
 0xd47   : > { %1555 = vrot.lane.b32.xlu1 %v2499_v16, %s2710_s9 }
 0xd48   : > { %2502 = vtanh.f32 %v3263_v61  ;;  %v2501_v14 = vpop.eup %2500 }
 0xd49   : > { %1559 = vrot.lane.b32.xlu0 %v2501_v14, %s2710_s9 }
 0xd4e   : > { %v2503_v15 = vpop.eup %2502 }
 0xd4f   : > { %1561 = vrot.lane.b32.xlu1 %v2503_v15, %s2710_s9 }
 0xd56   : > { %v1534_v20 = vpop.permute.xlu1 %1533 }
 0xd57   : > { %v3270_v62 = vadd.f32 %v1534_v20, %v1504_v0 }
 0xd59   : > { %2504 = vtanh.f32 %v3270_v62 }
 0xd5f   : > { %v2505_v22 = vpop.eup %2504 }
 0xd60   : > { %1557 = vrot.lane.b32.xlu2 %v2505_v22, %s2710_s9 }
 0xdb9   : > { %v1556_v38 = vpop.permute.xlu1 %1555 }
 0xdba   : > { %v1558_v58 = vpop.permute.xlu2 %1557  ;;  %v1567_v3 = vmul.f32 %v1556_v38, %v3242_v57 }
 0xdbb   : > { %v1568_v11 = vmul.f32 %v1558_v58, %v1455_v41  ;;  %v1560_v6 = vpop.permute.xlu0 %1559 }
 0xdbc   : > { %v3277_v21 = vsel %vm2007_vm5, %v3215_v9, %v1567_v3  ;;  %v1575_v5 = vrot.slane %v1567_v3, 5  ;;  %v1569_v51 = vmul.f32 %v1560_v6, %v1470_v42 }
 0xdbd   : > { %v3281_v63 = vsel %vm2007_vm5, %v3219_v49, %v1568_v11  ;;  %v1576_v1 = vrot.slane %v1568_v11, 4 }
 0xdbe   : > { %v1578_v55 = vrot.slane %v1569_v51, 3  ;;  %v3285_v4 = vsel %vm2007_vm5, %v3223_v60, %v1569_v51 }
 0xdbf   : > { %v1577_v26 = vsel %vm540_vm1, %v1576_v1, %v1575_v5 }
 0xdc0   : > { %v1579_v49 = vsel %vm543_vm2, %v1578_v55, %v1577_v26 }
 0xdc1   : > { %v1562_v25 = vpop.permute.xlu1 %1561 }
 0xdc2   : > { %v1570_v57 = vmul.f32 %v1562_v25, %v3246_v54 }
 0xdc4   : > { %v1580_v9 = vrot.slane %v1570_v57, 2  ;;  %v3291_v24 = vsel %vm2007_vm5, %v3228_v17, %v1570_v57 }
 0xdc6   : > { %v1581_v27 = vsel %vm546_vm3, %v1580_v9, %v1579_v49 }
 0xdc7   : > { %1582 = vrot.lane.b32.xlu2 %v1581_v27, %s2711_s13 }
 0xe21   : > { %v1583_v29 = vpop.permute.xlu2 %1582 }
 0xe22   : > { %2227 = vmatmul.msk.f32.vlgmr.msrb.gmra.mxu1 %vm351_vm4, %v1583_v29 }
 0xe9f   : > { %v1603_v60 = vpop.f32.mrf.mxu1 }
 0xea0   : > { %v1607_v30 = vrot.slane %v1603_v60, 2  ;;  %v1608_v31 = vrot.slane %v1603_v60, 3  ;;  %v1609_v54 = vrot.slane %v1603_v60, 4  ;;  %v1610_v33 = vrot.slane %v1603_v60, 5 }
 0xea2   : > { %v1615_v32 = vadd.f32 %v1607_v30, %v2915_v13  ;;  %v1616_v52 = vadd.f32 %v1608_v31, %v2918_v18  ;;  %v1617_v17 = vadd.f32 %v1609_v54, %v2922_v23  ;;  %v1618_v34 = vadd.f32 %v1610_v33, %v2926_v28 }
 0xea4   : > { %2506 = vtanh.f32 %v1615_v32  ;;  %v2230_v41 = vmul.f32 -1.442695, %v1617_v17  ;;  %v2228_v48 = vmul.f32 -1.442695, %v1615_v32  ;;  %v2229_v46 = vmul.f32 -1.442695, %v1616_v52 }
 0xea5   : > { %2508 = vtanh.f32 %v1616_v52  ;;  %v2231_v50 = vmul.f32 -1.442695, %v1618_v34 }
 0xea6   : > { %2510 = vtanh.f32 %v1617_v17 }
 0xea7   : > { %2512 = vtanh.f32 %v1618_v34 }
 0xea8   : > { %2514 = vpow2.f32 %v2230_v41 }
 0xeaa   : > { %v2507_v35 = vpop.eup %2506 }
 0xeab   : > { %v2509_v36 = vpop.eup %2508  ;;  %1719 = vrot.lane.b32.xlu0 %v2507_v35, %s2710_s9 }
 0xeac   : > { %1721 = vrot.lane.b32.xlu1 %v2509_v36, %s2710_s9  ;;  %v2511_v37 = vpop.eup %2510 }
 0xead   : > { %1723 = vrot.lane.b32.xlu2 %v2511_v37, %s2710_s9  ;;  %v2513_v39 = vpop.eup %2512 }
 0xeae   : > { %v2515_v43 = vpop.eup %2514 }
 0xeaf   : > { %v1633_v47 = vadd.f32 1.0, %v2515_v43 }
 0xeb1   : > { %2516 = vrcp.f32 %v1633_v47  ;;  %v1676_v14 = vand.u32 2147483648, %v1633_v47  ;;  %vm1670_vm7 = vweird.f32 %v1633_v47  ;;  %v1674_v15 = vand.u32 2147483647, %v1633_v47 }
 0xeb2   : > { %2518 = vpow2.f32 %v2228_v48 }
 0xeb3   : > { %1725 = vrot.lane.b32.xlu0 %v2513_v39, %s2710_s9  ;;  %2520 = vpow2.f32 %v2229_v46  ;;  %v1677_v22 = vor.u32 1.1754944e-38, %v1676_v14  ;;  %vm1675_vm9 = vcmp.eq.f32.partialorder %v1674_v15, 8.507059e+37 }
 0xeb4   : > { %2522 = vpow2.f32 %v2231_v50 }
 0xeb7   : > { %v2517_v42 = vpop.eup %2516 }
 0xeb8   : > { %v1666_v53 = vmul.f32 %v2517_v42, %v1633_v47  ;;  %v2519_v59 = vpop.eup %2518  ;;  %vm1671_vm6 = vweird.f32 %v2517_v42 }
 0xeb9   : > { %v2521_v45 = vpop.eup %2520  ;;  %v1631_v8 = vadd.f32 1.0, %v2519_v59  ;;  %vm1672_vm8 = vmor %vm1670_vm7, %vm1671_vm6  ;;  %v1704_v59 = vrot.slane %v3270_v62, 7  ;;  %v1703_v62 = vrot.slane %v3254_v56, 7 }
 0xeba   : > { %v1667_v7 = vsub.f32 1.0, %v1666_v53  ;;  %v1632_v10 = vadd.f32 1.0, %v2521_v45  ;;  %v2523_v40 = vpop.eup %2522 }
 0xebb   : > { %2524 = vrcp.f32 %v1631_v8  ;;  %v1634_v16 = vadd.f32 1.0, %v2523_v40  ;;  %v1646_v27 = vand.u32 2147483648, %v1631_v8  ;;  %vm1640_vm12 = vweird.f32 %v1631_v8 }
 0xebc   : > { %v1668_v12 = vmul.f32 %v2517_v42, %v1667_v7  ;;  %2526 = vrcp.f32 %v1632_v10  ;;  %v1661_v29 = vand.u32 2147483648, %v1632_v10  ;;  %v1644_v60 = vand.u32 2147483647, %v1631_v8 }
 0xebd   : > { %2528 = vrcp.f32 %v1634_v16  ;;  %vm1655_vm13 = vweird.f32 %v1632_v10  ;;  %v1659_v30 = vand.u32 2147483647, %v1632_v10  ;;  %v1647_v52 = vor.u32 1.1754944e-38, %v1646_v27 }
 0xebe   : > { %v1669_v44 = vadd.f32 %v2517_v42, %v1668_v12  ;;  %v1662_v33 = vor.u32 1.1754944e-38, %v1661_v29  ;;  %vm1645_vm0 = vcmp.eq.f32.partialorder %v1644_v60, 8.507059e+37  ;;  %v1691_v43 = vand.u32 2147483648, %v1634_v16 }
 0xebf   : > { %vm1660_vm5 = vcmp.eq.f32.partialorder %v1659_v30, 8.507059e+37  ;;  %vm1685_vm7 = vweird.f32 %v1634_v16  ;;  %v1689_v47 = vand.u32 2147483647, %v1634_v16 }
 0xec0   : > { %v1673_v20 = vsel %vm1672_vm8, %v2517_v42, %v1669_v44  ;;  %v1692_v46 = vor.u32 1.1754944e-38, %v1691_v43 }
 0xec1   : > { %v2525_v19 = vpop.eup %2524  ;;  %v3305_v3 = vsel %vm1675_vm9, %v1677_v22, %v1673_v20  ;;  %vm1690_vm9 = vcmp.eq.f32.partialorder %v1689_v47, 8.507059e+37 }
 0xec2   : > { %v2527_v0 = vpop.eup %2526  ;;  %v1636_v38 = vmul.f32 %v2525_v19, %v1631_v8  ;;  %vm1641_vm10 = vweird.f32 %v2525_v19 }
 0xec3   : > { %v1651_v11 = vmul.f32 %v2527_v0, %v1632_v10  ;;  %v2529_v6 = vpop.eup %2528  ;;  %vm1656_vm11 = vweird.f32 %v2527_v0  ;;  %vm1642_vm14 = vmor %vm1640_vm12, %vm1641_vm10  ;;  %v1705_v10 = vrot.slane %v3259_v2, 7  ;;  %vm2012_vm10 = vcmask 1045504  }
 0xec4   : > { %v1637_v5 = vsub.f32 1.0, %v1636_v38  ;;  %v1681_v55 = vmul.f32 %v2529_v6, %v1634_v16  ;;  %vm1657_vm15 = vmor %vm1655_vm13, %vm1656_vm11  ;;  %vm1686_vm6 = vweird.f32 %v2529_v6 }
 0xec5   : > { %v1652_v51 = vsub.f32 1.0, %v1651_v11  ;;  %vm1687_vm8 = vmor %vm1685_vm7, %vm1686_vm6  ;;  %v1713_v12 = vmul.f32 %v1705_v10, %v3305_v3 }
 0xec6   : > { %v1638_v25 = vmul.f32 %v2525_v19, %v1637_v5  ;;  %v1682_v9 = vsub.f32 1.0, %v1681_v55 }
 0xec7   : > { %v1653_v57 = vmul.f32 %v2527_v0, %v1652_v51 }
 0xec8   : > { %v1639_v26 = vadd.f32 %v2525_v19, %v1638_v25  ;;  %v1683_v54 = vmul.f32 %v2529_v6, %v1682_v9 }
 0xec9   : > { %v1654_v49 = vadd.f32 %v2527_v0, %v1653_v57 }
 0xeca   : > { %v1643_v31 = vsel %vm1642_vm14, %v2525_v19, %v1639_v26  ;;  %v1684_v39 = vadd.f32 %v2529_v6, %v1683_v54 }
 0xecb   : > { %v1658_v32 = vsel %vm1657_vm15, %v2527_v0, %v1654_v49  ;;  %v1648_v34 = vsel %vm1645_vm0, %v1647_v52, %v1643_v31  ;;  %v1706_v0 = vrot.slane %v3263_v61, 7 }
 0xecc   : > { %v1663_v36 = vsel %vm1660_vm5, %v1662_v33, %v1658_v32  ;;  %v1688_v48 = vsel %vm1687_vm8, %v2529_v6, %v1684_v39  ;;  %v1711_v15 = vmul.f32 %v1703_v62, %v1648_v34 }
 0xecd   : > { %v1693_v42 = vsel %vm1690_vm9, %v1692_v46, %v1688_v48  ;;  %v1712_v45 = vmul.f32 %v1704_v59, %v1663_v36 }
 0xece   : > { %v1714_v20 = vmul.f32 %v1706_v0, %v1693_v42 }
 0xf07   : > { %v1724_v58 = vpop.permute.xlu2 %1723 }
 0xf08   : > { %v1733_v1 = vmul.f32 %v1724_v58, %v3305_v3 }
 0xf0a   : > { %1743 = vrot.lane.b32.xlu0 %v1733_v1, %s2711_s13 }
 0xf1d   : > { %v1720_v17 = vpop.permute.xlu0 %1719 }
 0xf1e   : > { %v1722_v35 = vpop.permute.xlu1 %1721  ;;  %v1731_v37 = vmul.f32 %v1720_v17, %v1648_v34 }
 0xf1f   : > { %v1732_v41 = vmul.f32 %v1722_v35, %v1663_v36 }
 0xf20   : > { %1739 = vrot.lane.b32.xlu1 %v1731_v37, %s2711_s13 }
 0xf21   : > { %1741 = vrot.lane.b32.xlu2 %v1732_v41, %s2711_s13 }
 0xf25   : > { %v1726_v50 = vpop.permute.xlu0 %1725 }
 0xf26   : > { %v1734_v53 = vmul.f32 %v1726_v50, %v1693_v42 }
 0xf28   : > { %1745 = vrot.lane.b32.xlu1 %v1734_v53, %s2711_s13 }
 0xf7b   : > { %v1742_v7 = vpop.permute.xlu2 %1741 }
 0xf7c   : > { %v3313_v8 = vadd.f32 %v1742_v7, %v1712_v45  ;;  %v1744_v40 = vpop.permute.xlu0 %1743 }
 0xf7d   : > { %v3318_v44 = vadd.f32 %v1744_v40, %v1713_v12 }
 0xf7e   : > { %2530 = vtanh.f32 %v3313_v8 }
 0xf7f   : > { %2532 = vtanh.f32 %v3318_v44 }
 0xf84   : > { %v2531_v16 = vpop.eup %2530 }
 0xf85   : > { %1765 = vrot.lane.b32.xlu0 %v2531_v16, %s2710_s9  ;;  %v2533_v14 = vpop.eup %2532 }
 0xf86   : > { %1767 = vrot.lane.b32.xlu1 %v2533_v14, %s2710_s9 }
 0xf92   : > { %v1740_v19 = vpop.permute.xlu1 %1739 }
 0xf93   : > { %v3324_v2 = vadd.f32 %v1740_v19, %v1711_v15 }
 0xf95   : > { %2534 = vtanh.f32 %v3324_v2 }
 0xf9a   : > { %v1746_v22 = vpop.permute.xlu1 %1745 }
 0xf9b   : > { %v2535_v38 = vpop.eup %2534  ;;  %v3328_v58 = vadd.f32 %v1746_v22, %v1714_v20 }
 0xf9c   : > { %1763 = vrot.lane.b32.xlu2 %v2535_v38, %s2710_s9 }
 0xf9d   : > { %2536 = vtanh.f32 %v3328_v58 }
 0xfa3   : > { %v2537_v11 = vpop.eup %2536 }
 0xfa4   : > { %1769 = vrot.lane.b32.xlu2 %v2537_v11, %s2710_s9 }
 0xff6   : > { %v1764_v56 = vpop.permute.xlu2 %1763 }
 0xff7   : > { %v1766_v1 = vpop.permute.xlu0 %1765  ;;  %v1775_v5 = vmul.f32 %v1764_v56, %v1648_v34 }
 0xff8   : > { %v1776_v6 = vmul.f32 %v1766_v1, %v1663_v36  ;;  %v1768_v57 = vpop.permute.xlu1 %1767 }
 0xff9   : > { %v3335_v61 = vsel %vm2012_vm10, %v3277_v21, %v1775_v5  ;;  %v1783_v55 = vrot.slane %v1775_v5, 6  ;;  %v1777_v26 = vmul.f32 %v1768_v57, %v3305_v3 }
 0xffa   : > { %v3339_v51 = vsel %vm2012_vm10, %v3281_v63, %v1776_v6  ;;  %v1784_v25 = vrot.slane %v1776_v6, 5 }
 0xffb   : > { %v1786_v49 = vrot.slane %v1777_v26, 4  ;;  %v3345_v60 = vsel %vm2012_vm10, %v3285_v4, %v1777_v26 }
 0xffc   : > { %v1785_v29 = vsel %vm540_vm1, %v1784_v25, %v1783_v55 }
 0xffd   : > { %v1787_v63 = vsel %vm543_vm2, %v1786_v49, %v1785_v29 }
 0xffe   : > { %v1770_v9 = vpop.permute.xlu2 %1769 }
 0xfff   : > { %v1778_v27 = vmul.f32 %v1770_v9, %v1693_v42 }
0x1001   : > { %v1788_v21 = vrot.slane %v1778_v27, 3  ;;  %v3349_v30 = vsel %vm2012_vm10, %v3291_v24, %v1778_v27 }
0x1003   : > { %v1789_v31 = vsel %vm546_vm3, %v1788_v21, %v1787_v63 }
0x1004   : > { %1790 = vrot.lane.b32.xlu0 %v1789_v31, %s2711_s13 }
0x1076   : > { %v1791_v3 = vpop.permute.xlu0 %1790 }
0x1077   : > { %2232 = vmatmul.msk.f32.vlgmr.msrb.gmra.mxu2 %vm351_vm4, %v1791_v3 }
0x10fa   : > { %v1811_v54 = vpop.f32.mrf.mxu2 }
0x10fb   : > { %v1815_v32 = vrot.slane %v1811_v54, 1  ;;  %v1816_v52 = vrot.slane %v1811_v54, 2  ;;  %v1817_v33 = vrot.slane %v1811_v54, 3  ;;  %v1818_v34 = vrot.slane %v1811_v54, 4 }
0x10fd   : > { %v1823_v4 = vadd.f32 %v1815_v32, %v2915_v13  ;;  %v1824_v17 = vadd.f32 %v1816_v52, %v2918_v18  ;;  %v1825_v24 = vadd.f32 %v1817_v33, %v2922_v23  ;;  %v1826_v35 = vadd.f32 %v1818_v34, %v2926_v28 }
0x10ff   : > { %2538 = vtanh.f32 %v1823_v4  ;;  %v2234_v18 = vmul.f32 -1.442695, %v1824_v17  ;;  %v2233_v43 = vmul.f32 -1.442695, %v1823_v4  ;;  %v2235_v48 = vmul.f32 -1.442695, %v1825_v24 }
0x1100   : > { %2540 = vtanh.f32 %v1824_v17  ;;  %v2236_v42 = vmul.f32 -1.442695, %v1826_v35 }
0x1101   : > { %2542 = vtanh.f32 %v1825_v24 }
0x1102   : > { %2544 = vtanh.f32 %v1826_v35 }
0x1103   : > { %2546 = vpow2.f32 %v2234_v18 }
0x1105   : > { %v2539_v36 = vpop.eup %2538 }
0x1106   : > { %v2541_v37 = vpop.eup %2540  ;;  %1927 = vrot.lane.b32.xlu1 %v2539_v36, %s2710_s9 }
0x1107   : > { %1929 = vrot.lane.b32.xlu2 %v2541_v37, %s2710_s9  ;;  %v2543_v39 = vpop.eup %2542 }
0x1108   : > { %1931 = vrot.lane.b32.xlu0 %v2543_v39, %s2710_s9  ;;  %v2545_v13 = vpop.eup %2544 }
0x1109   : > { %v2547_v41 = vpop.eup %2546 }
0x110a   : > { %v1840_v23 = vadd.f32 1.0, %v2547_v41 }
0x110c   : > { %2548 = vrcp.f32 %v1840_v23  ;;  %v1869_v10 = vand.u32 2147483648, %v1840_v23  ;;  %vm1863_vm2 = vweird.f32 %v1840_v23  ;;  %v1867_v12 = vand.u32 2147483647, %v1840_v23 }
0x110d   : > { %2550 = vpow2.f32 %v2233_v43  ;;  %v1911_v43 = vrot.slane %v3324_v2, 7  ;;  %v1913_v2 = vrot.slane %v3318_v44, 7 }
0x110e   : > { %1933 = vrot.lane.b32.xlu1 %v2545_v13, %s2710_s9  ;;  %2552 = vpow2.f32 %v2235_v48  ;;  %v1870_v62 = vor.u32 1.1754944e-38, %v1869_v10  ;;  %vm1868_vm11 = vcmp.eq.f32.partialorder %v1867_v12, 8.507059e+37 }
0x110f   : > { %2554 = vpow2.f32 %v2236_v42 }
0x1112   : > { %v2549_v28 = vpop.eup %2548 }
0x1113   : > { %v1859_v47 = vmul.f32 %v2549_v28, %v1840_v23  ;;  %v2551_v50 = vpop.eup %2550  ;;  %vm1864_vm1 = vweird.f32 %v2549_v28 }
0x1114   : > { %v1839_v59 = vadd.f32 1.0, %v2551_v50  ;;  %v2553_v7 = vpop.eup %2552  ;;  %vm1865_vm3 = vmor %vm1863_vm2, %vm1864_vm1  ;;  %vm2017_vm2 = vcmask 1046528  }
0x1115   : > { %v1860_v46 = vsub.f32 1.0, %v1859_v47  ;;  %v2555_v40 = vpop.eup %2554  ;;  %v1841_v16 = vadd.f32 1.0, %v2553_v7  ;;  %v1912_v47 = vrot.slane %v3313_v8, 7 }
0x1116   : > { %2556 = vrcp.f32 %v1839_v59  ;;  %v1842_v15 = vadd.f32 1.0, %v2555_v40  ;;  %v1854_v9 = vand.u32 2147483648, %v1839_v59  ;;  %vm1848_vm13 = vweird.f32 %v1839_v59 }
0x1117   : > { %v1861_v53 = vmul.f32 %v2549_v28, %v1860_v46  ;;  %2558 = vrcp.f32 %v1841_v16  ;;  %v1852_v27 = vand.u32 2147483647, %v1839_v59  ;;  %vm1878_vm5 = vweird.f32 %v1841_v16 }
0x1118   : > { %2560 = vrcp.f32 %v1842_v15  ;;  %v1855_v63 = vor.u32 1.1754944e-38, %v1854_v9  ;;  %v1884_v3 = vand.u32 2147483648, %v1841_v16  ;;  %v1882_v52 = vand.u32 2147483647, %v1841_v16 }
0x1119   : > { %v1862_v45 = vadd.f32 %v2549_v28, %v1861_v53  ;;  %vm1853_vm0 = vcmp.eq.f32.partialorder %v1852_v27, 8.507059e+37  ;;  %v1899_v17 = vand.u32 2147483648, %v1842_v15  ;;  %vm1893_vm8 = vweird.f32 %v1842_v15 }
0x111a   : > { %v1897_v24 = vand.u32 2147483647, %v1842_v15  ;;  %v1885_v35 = vor.u32 1.1754944e-38, %v1884_v3  ;;  %vm1883_vm10 = vcmp.eq.f32.partialorder %v1882_v52, 8.507059e+37 }
0x111b   : > { %v1866_v14 = vsel %vm1865_vm3, %v2549_v28, %v1862_v45  ;;  %v1900_v13 = vor.u32 1.1754944e-38, %v1899_v17  ;;  %v1914_v45 = vrot.slane %v3328_v58, 7  ;;  %vm2079_vm3 = vcmask 64512  }
0x111c   : > { %v3363_v0 = vsel %vm1868_vm11, %v1870_v62, %v1866_v14  ;;  %v2557_v20 = vpop.eup %2556  ;;  %vm1898_vm1 = vcmp.eq.f32.partialorder %v1897_v24, 8.507059e+37 }
0x111d   : > { %v1844_v38 = vmul.f32 %v2557_v20, %v1839_v59  ;;  %v2559_v11 = vpop.eup %2558  ;;  %vm1849_vm12 = vweird.f32 %v2557_v20  ;;  %v1920_v46 = vmul.f32 %v1912_v47, %v3363_v0 }
0x111e   : > { %v2561_v1 = vpop.eup %2560  ;;  %v1874_v5 = vmul.f32 %v2559_v11, %v1841_v16  ;;  %vm1850_vm14 = vmor %vm1848_vm13, %vm1849_vm12  ;;  %vm1879_vm15 = vweird.f32 %v2559_v11 }
0x111f   : > { %v1845_v56 = vsub.f32 1.0, %v1844_v38  ;;  %v1889_v25 = vmul.f32 %v2561_v1, %v1842_v15  ;;  %vm1894_vm6 = vweird.f32 %v2561_v1  ;;  %vm1880_vm7 = vmor %vm1878_vm5, %vm1879_vm15 }
0x1120   : > { %v1875_v55 = vsub.f32 1.0, %v1874_v5  ;;  %vm1895_vm9 = vmor %vm1893_vm8, %vm1894_vm6 }
0x1121   : > { %v1846_v6 = vmul.f32 %v2557_v20, %v1845_v56  ;;  %v1890_v26 = vsub.f32 1.0, %v1889_v25 }
0x1122   : > { %v1876_v49 = vmul.f32 %v2559_v11, %v1875_v55 }
0x1123   : > { %v1847_v57 = vadd.f32 %v2557_v20, %v1846_v6  ;;  %v1891_v21 = vmul.f32 %v2561_v1, %v1890_v26 }
0x1124   : > { %v1877_v31 = vadd.f32 %v2559_v11, %v1876_v49  ;;  %v2313_v49 = vld [vmem:[%s3451_s5] ss:$0 sm:$0xff] }
0x1125   : > { %v1851_v29 = vsel %vm1850_vm14, %v2557_v20, %v1847_v57  ;;  %v1892_v4 = vadd.f32 %v2561_v1, %v1891_v21 }
0x1126   : > { %v1856_v32 = vsel %vm1853_vm0, %v1855_v63, %v1851_v29  ;;  %v1881_v34 = vsel %vm1880_vm7, %v2559_v11, %v1877_v31 }
0x1127   : > { %v1896_v36 = vsel %vm1895_vm9, %v2561_v1, %v1892_v4  ;;  %v1886_v39 = vsel %vm1883_vm10, %v1885_v35, %v1881_v34  ;;  %v1919_v48 = vmul.f32 %v1911_v43, %v1856_v32 }
0x1128   : > { %v1901_v41 = vsel %vm1898_vm1, %v1900_v13, %v1896_v36  ;;  %v1921_v14 = vmul.f32 %v1913_v2, %v1886_v39 }
0x1129   : > { %v1922_v7 = vmul.f32 %v1914_v45, %v1901_v41 }
0x1161   : > { %v1930_v19 = vpop.permute.xlu2 %1929 }
0x1162   : > { %v1940_v22 = vmul.f32 %v1930_v19, %v3363_v0 }
0x1164   : > { %1949 = vrot.lane.b32.xlu0 %v1940_v22, %s2711_s13 }
0x1178   : > { %v1928_v54 = vpop.permute.xlu1 %1927 }
0x1179   : > { %v1939_v33 = vmul.f32 %v1928_v54, %v1856_v32 }
0x117a   : > { %v1932_v37 = vpop.permute.xlu0 %1931 }
0x117b   : > { %1947 = vrot.lane.b32.xlu2 %v1939_v33, %s2711_s13  ;;  %v1941_v18 = vmul.f32 %v1932_v37, %v1886_v39 }
0x117d   : > { %1951 = vrot.lane.b32.xlu1 %v1941_v18, %s2711_s13 }
0x1180   : > { %v1934_v23 = vpop.permute.xlu1 %1933 }
0x1181   : > { %v1942_v28 = vmul.f32 %v1934_v23, %v1901_v41 }
0x1183   : > { %1953 = vrot.lane.b32.xlu2 %v1942_v28, %s2711_s13 }
0x11d5   : > { %v1948_v42 = vpop.permute.xlu2 %1947 }
0x11d6   : > { %v1950_v50 = vpop.permute.xlu0 %1949  ;;  %v1959_v53 = vadd.f32 %v1948_v42, %v1919_v48 }
0x11d7   : > { %v1960_v59 = vadd.f32 %v1950_v50, %v1920_v46 }
0x11d8   : > { %2562 = vtanh.f32 %v1959_v53 }
0x11d9   : > { %2564 = vtanh.f32 %v1960_v59 }
0x11dd   : > { %v1954_v10 = vpop.permute.xlu2 %1953 }
0x11de   : > { %v2563_v12 = vpop.eup %2562  ;;  %v1962_v40 = vadd.f32 %v1954_v10, %v1922_v7 }
0x11df   : > { %v2565_v16 = vpop.eup %2564  ;;  %1971 = vrot.lane.b32.xlu0 %v2563_v12, %s2710_s9 }
0x11e0   : > { %2566 = vtanh.f32 %v1962_v40  ;;  %1973 = vrot.lane.b32.xlu1 %v2565_v16, %s2710_s9 }
0x11e6   : > { %v2567_v8 = vpop.eup %2566 }
0x11e7   : > { %1977 = vrot.lane.b32.xlu0 %v2567_v8, %s2710_s9 }
0x11ef   : > { %v1952_v62 = vpop.permute.xlu1 %1951 }
0x11f0   : > { %v1961_v15 = vadd.f32 %v1952_v62, %v1921_v14 }
0x11f2   : > { %2568 = vtanh.f32 %v1961_v15 }
0x11f8   : > { %v2569_v58 = vpop.eup %2568 }
0x11f9   : > { %1975 = vrot.lane.b32.xlu2 %v2569_v58, %s2710_s9  ;;  %s2099_s9 = sshll.u32 %s2096_s30, 4  ;;  %s2100_s9 = int_to_ptr.hbm [resolvable:$true] %s2099_s9 }
0x11fa   : > { %s2648_s26 = sshra.s32 %s2100_s9, 4  ;;  %s2649_s26 = int_to_ptr.hbm [resolvable:$true] %s2648_s26 }
0x11fb   : > { %s2650_s25 = scalar_lea.hbm %s2649_s26, 32  ;;  %p2655_p11 = scmp.lt.s32.totalorder %s2649_s26, %s3452_s6 }
0x11fc   : > { %p2651_p1 = scmp.ne.s32.totalorder %s2649_s26, %s2650_s25  ;;  %p2656_p9 = scmp.lt.s32.totalorder %s2654_s10, %s2650_s25 }
0x11fe   : > { %p2652_p4 = pnand %p2651_p1, %p2818_p3  ;;  %p2657_p2 = por %p2656_p9, %p2655_p11 }
0x1200   : > { %p2653_p8 = pneg %p2652_p4 }
0x1202   : > { %p2658_p10 = pnand %p2657_p2, %p2653_p8 }
0x1251   : > { %v1972_v19 = vpop.permute.xlu0 %1971 }
0x1252   : > { %v1974_v20 = vpop.permute.xlu1 %1973  ;;  %v1983_v22 = vmul.f32 %v1972_v19, %v1856_v32 }
0x1253   : > { %v1984_v38 = vmul.f32 %v1974_v20, %v3363_v0  ;;  %v1976_v44 = vpop.permute.xlu2 %1975 }
0x1254   : > { %v2018_v11 = vsel %vm2017_vm2, %v3335_v61, %v1983_v22  ;;  %v1985_v1 = vmul.f32 %v1976_v44, %v1886_v39  ;;  %v2025_v61 = vld [vmem:[%s3450_s4 + $0x18] sm:$0xff] }
0x1255   : > { %v2019_v56 = vsel %vm2017_vm2, %v3339_v51, %v1984_v38  ;;  %2034 = vrot.lane.b32.xlu1 %v2018_v11, %s2711_s13  ;;  %v2024_v51 = vld [vmem:[%s3450_s4 + $0x10] sm:$0xff]  ;;  %2062 = vmatpush.msra.mxu3 %v2025_v61 }
0x1256   : > { %2036 = vrot.lane.b32.xlu2 %v2019_v56, %s2711_s13  ;;  %v2020_v6 = vsel %vm2017_vm2, %v3345_v60, %v1985_v1  ;;  %v2023_v60 = vld [vmem:[%s3450_s4 + $0x8] sm:$0xff] }
0x1257   : > { %2038 = vrot.lane.b32.xlu0 %v2020_v6, %s2711_s13  ;;  %2063 = vmatpush.msra.mxu3 %v2024_v51 }
0x1259   : > { %v1978_v5 = vpop.permute.xlu0 %1977  ;;  %2064 = vmatpush.msra.mxu3 %v2023_v60 }
0x125a   : > { %v1986_v25 = vmul.f32 %v1978_v5, %v1901_v41 }
0x125c   : > { %v2021_v55 = vsel %vm2017_vm2, %v3349_v30, %v1986_v25  ;;  %v2022_v30 = vld [vmem:[%s3450_s4] sm:$0xff] }
0x125d   : > { %2040 = vrot.lane.b32.xlu1 %v2021_v55, %s2711_s13  ;;  %2065 = vmatpush.msra.mxu3 %v2022_v30 }
0x12b0   : > { %v2037_v57 = vpop.permute.xlu2 %2036 }
0x12c7   : > { %v2035_v0 = vpop.permute.xlu1 %2034 }
0x12c8   : > { %2237 = vmatmul.msk.f32.vlgmr.msra.gmra.mxu3 %vm351_vm4, %v2035_v0 }
0x12c9   : > { %v2039_v26 = vpop.permute.xlu0 %2038 }
0x12cf   : > { %v2041_v9 = vpop.permute.xlu1 %2040 }
0x12d0   : > { %2238 = vmatmul.msk.f32.gmra.mxu3 %vm351_vm4, %v2037_v57 }
0x12d8   : > { %2239 = vmatmul.msk.f32.gmra.mxu3 %vm351_vm4, %v2039_v26 }
0x12e0   : > { %2240 = vmatmul.msk.f32.gmra.mxu3 %vm351_vm4, %v2041_v9 }
0x134b   : > { %v2067_v27 = vpop.f32.mrf.mxu3 }
0x134c   : > { %v2068_v29 = vadd.f32 %v2313_v49, %v2067_v27 }
0x134e   : > { %2080 = vst.msk [vmem:[%s288_s14] sm:$0xff] %vm2079_vm3, %v2068_v29 }
0x1353   : > { %v2070_v21 = vpop.f32.mrf.mxu3 }
0x1354   : > { %v2071_v63 = vadd.f32 %v2313_v49, %v2070_v21 }
0x1356   : > { %2081 = vst.msk [vmem:[%s288_s14 + $0x8] sm:$0xff] %vm2079_vm3, %v2071_v63 }
0x135b   : > { %v2073_v31 = vpop.f32.mrf.mxu3 }
0x135c   : > { %v2074_v3 = vadd.f32 %v2313_v49, %v2073_v31 }
0x135e   : > { %2082 = vst.msk [vmem:[%s288_s14 + $0x10] sm:$0xff] %vm2079_vm3, %v2074_v3 }
0x1363   : > { %v2076_v54 = vpop.f32.mrf.mxu3 }
0x1364   : > { %v2077_v32 = vadd.f32 %v2313_v49, %v2076_v54 }
0x1366   : > { %2083 = vst.msk [vmem:[%s288_s14 + $0x18] sm:$0xff] %vm2079_vm3, %v2077_v32 }
0x1367   : > { %2661 = shalt.err (!%p2658_p10)
}
0x1368   : > { %s2712_s19 = smov 128   ;;  %s2713_s14 = smov 8  }
0x1369   : > { %2254 = dma.vmem_to_hbm [thread:$0]  (%p2818_p3), %s2098_s18, 512, %s2100_s9, %s2085_s12, %s2712_s19, %s2712_s19, %s2713_s14  }
0x136a PF: > { %s2114_s15 = sand.u32 1, %s2692_s21   ;;  %p3462_p12 = scmp.ge.s32.totalorder %s2704_s24, 2 }
0x136b   : > { %s2115_s20 = scalar_lea.sflag [#allocation4], %s2114_s15 }
0x136c   : > { %p2265_p13 = pnand %p3462_p12, %p2784_p6 }
0x136e   : > { %p2266_p0 = pneg %p2265_p13 }
0x1370   : > { %2687 = dma.done.wait (%p2266_p0), %s2115_s20, 512  }
0x1371   : > { %2689 = vsyncadd (%p2266_p0), %s2115_s20, 4294966784  ;;  %p20_p5 = scmp.ge.s32.totalorder %s2802_s11, 4   ;;  %s3463_s21 = smov %s2696_s22 }
0x1372   : > { %s3464_s22 = smov %s2700_s23  ;;  %s3465_s23 = smov %s2814_s16 }
0x1373   : > { %s3466_s24 = smov %s2802_s11  ;;  %22 = sbr.rel (!%p20_p5) target bundleno = 6 (0x6), region = 93 }
0x1378   :  { %2121 = vsyncpa [#allocation3], 1 }
0x1379   :  { %2123 = vsyncpa [#allocation3 + $0x1], 1 }
0x137a   :  { %2124 = vsyncpa [#allocation6], 1 }
0x137b   :  { %2125 = vsyncpa [#allocation4], 1 }
0x137c   :  { %2127 = vsyncpa [#allocation4 + $0x1], 1 }

</bundles_post_ra>
